<compile_context>
chip_gen: v7x
topology: tpu7x:2x2x1
jax: 0.10.0
libtpu: 0.0.40
codegen_flags: <defaults>
</compile_context>

<pallas_src>
import jax
import jax.numpy as jnp
from jax.experimental import pallas as pl
from jax.experimental.pallas import tpu as pltpu

# Small deterministic config consistent with the GMN module structure.
VOCAB_SIZE = 100      # original: 21128
EMB_DIM    = 32       # original: 768
SEQ_LEN    = 16       # original MAX_SEQ_LEN: 50
TURN_NUM   = 3        # original MAX_TURN_NUM: 5
GCN_OUT    = 10
MP_HID     = 20
FFN_HID    = 40
BATCH      = 2

N_STACK = (TURN_NUM + 1) * SEQ_LEN   # stacked rows: T utterances + response

# --- row layout of the packed parameter slab (every section start 8-aligned) ---
GCNW_R     = 0       # [D, GCN_OUT]            gcn_w
CW_R       = 32      # [D, GCN_OUT]            cross_w
ATTN_R     = 64      # [(T+1)S, (T+1)S]        block-diag attention_coef
AWT_R      = 128     # [(T+1)S, GCN_OUT]       assign_weight tiled (T+1)x
W1S_R      = 192     # [GCN_OUT, MP_HID]       mp_w1[1:]  ("self" rows)
W2_R       = 208     # [MP_HID, MP_HID]        mp_w2
FW1_R      = 232     # 4 x [MP_HID, FFN_HID]   ffn_w1 row-blocks, stride 24 rows
FW1_STRIDE = 24
FW2_R      = 328     # [FFN_HID, 1]            ffn_w2
BIAS_R     = 368     # rows: gcn_b, mp_b1, mp_b2, ffn_b1, ffn_b2, mp_w1[0]
PACK_ROWS  = 376


def gmn_kernel(x_ref, a_ref, w_ref, out_ref):
    f32 = jnp.float32
    S, T = SEQ_LEN, TURN_NUM
    N = N_STACK
    bb = x_ref.shape[0]          # batch elements handled by this grid step

    # ---- static, sublane-aligned slices of the packed weight slab ----
    gcn_w   = w_ref[GCNW_R:GCNW_R + EMB_DIM, 0:GCN_OUT]          # [32, 10]
    cross_w = w_ref[CW_R:CW_R + EMB_DIM, 0:GCN_OUT]              # [32, 10]
    attn_bd = w_ref[ATTN_R:ATTN_R + N, 0:N]                      # [64, 64]
    aw      = w_ref[AWT_R:AWT_R + N, 0:GCN_OUT]                  # [64, 10]
    w1s     = w_ref[W1S_R:W1S_R + GCN_OUT, 0:MP_HID]             # [10, 20]
    w2      = w_ref[W2_R:W2_R + MP_HID, 0:MP_HID]                # [20, 20]
    fw1 = [w_ref[FW1_R + k * FW1_STRIDE:FW1_R + k * FW1_STRIDE + MP_HID, 0:FFN_HID]
           for k in range(4)]                                    # 4 x [20, 40]
    fw2     = w_ref[FW2_R:FW2_R + FFN_HID, 0:1]                  # [40, 1]
    gcn_b   = w_ref[BIAS_R + 0:BIAS_R + 1, 0:GCN_OUT]            # [1, 10]
    mp_b1   = w_ref[BIAS_R + 1:BIAS_R + 2, 0:MP_HID]             # [1, 20]
    mp_b2   = w_ref[BIAS_R + 2:BIAS_R + 3, 0:MP_HID]             # [1, 20]
    ffn_b1  = w_ref[BIAS_R + 3:BIAS_R + 4, 0:FFN_HID]            # [1, 40]
    ffn_b2  = w_ref[BIAS_R + 4:BIAS_R + 5, 0:1]                  # [1, 1]
    w1d     = w_ref[BIAS_R + 5:BIAS_R + 6, 0:MP_HID]             # [1, 20]  mp_w1[0] (dist row)

    # torch cosine_similarity eps: max(||v||, 1e-8) == sqrt(max(||v||^2, 1e-16)),
    # applied to each norm separately.
    eps2 = 1e-16

    for i in range(bb):
        x   = x_ref[i]            # [(T+1)S, D]  rows: [u_0; ...; u_{T-1}; r]
        adj = a_ref[i]            # [(T+1)S, (T+1)S] block-diag normalized adjacency

        # -- projections (two matmuls; both outputs lane-0 based, no lane offsets) --
        proj_g = jnp.dot(x, gcn_w,   preferred_element_type=f32)   # [64, 10]
        proj_c = jnp.dot(x, cross_w, preferred_element_type=f32)   # [64, 10]

        # -- dense GCN for all turns + response in ONE push; attn-cross likewise --
        # block t (t<T): self = A_t u_t Wg          cross = attn (u_t cw)  (= r_cross[t])
        # block T:       self = A_r r  Wg           cross = attn (r  cw)   (= u_cross)
        self_all  = jnp.dot(adj,     proj_g, preferred_element_type=f32) + gcn_b   # [64,10]
        cross_all = jnp.dot(attn_bd, proj_c, preferred_element_type=f32)           # [64,10]

        # -- batched cosine similarities (4 lane-reductions total) --
        aws = aw * self_all           # [64,10]  assign_weight * self feature
        awc = aw * cross_all          # [64,10]  assign_weight * cross feature

        sa = jnp.sum(aws * aws, axis=1, keepdims=True)     # [64,1]
        sb = jnp.sum(awc * awc, axis=1, keepdims=True)     # [64,1]

        aws_u = aws[0:T * S]          # [48,10]  aw * u_self[t]
        aws_r = aws[T * S:N]          # [16,10]  aw * r_self
        awc_r = awc[0:T * S]          # [48,10]  aw * r_cross[t]
        awc_u = awc[T * S:N]          # [16,10]  aw * u_cross

        num_u = jnp.sum(aws_u * jnp.tile(awc_u, (T, 1)), axis=1, keepdims=True)  # [48,1]
        num_r = jnp.sum(jnp.tile(aws_r, (T, 1)) * awc_r, axis=1, keepdims=True)  # [48,1]

        inv_u = (jax.lax.rsqrt(jnp.maximum(sa[0:T * S], eps2)) *
                 jax.lax.rsqrt(jnp.maximum(jnp.tile(sb[T * S:N], (T, 1)), eps2)))
        inv_r = (jax.lax.rsqrt(jnp.maximum(jnp.tile(sa[T * S:N], (T, 1)), eps2)) *
                 jax.lax.rsqrt(jnp.maximum(sb[0:T * S], eps2)))

        dist_u = num_u * inv_u        # [48,1] cosine(aw*u_self[t], aw*u_cross)
        dist_r = num_r * inv_r        # [48,1] cosine(aw*r_self,   aw*r_cross[t])

        # -- multi-perspective FFN layer 1 (dist column folded in:
        #    cat([d, f]) @ W1 + b1 == d*W1[0] + f @ W1[1:] + b1) --
        l1 = jnp.dot(self_all, w1s, preferred_element_type=f32) + mp_b1          # [64,20]
        hu = jnp.maximum(dist_u * w1d + l1[0:T * S], 0.0)                        # [48,20]
        hr = jnp.maximum(dist_r * w1d + jnp.tile(l1[T * S:N], (T, 1)), 0.0)      # [48,20]

        # -- multi-perspective FFN layer 2 --
        h2u = jnp.dot(hu, w2, preferred_element_type=f32) + mp_b2                # [48,20]
        h2r = jnp.dot(hr, w2, preferred_element_type=f32) + mp_b2                # [48,20]

        # -- per-turn max pooling over the S tokens (one reduce per side) --
        g_u = jnp.max(h2u.reshape(T, S, MP_HID), axis=1)                         # [T,20]
        g_r = jnp.max(h2r.reshape(T, S, MP_HID), axis=1)                         # [T,20]

        # -- final FFN: cat([g_u, g_r, g_u*g_r, |g_u-g_r|]) @ fW1 as 4 row-block matmuls --
        z = (jnp.dot(g_u,               fw1[0], preferred_element_type=f32)
             + jnp.dot(g_r,             fw1[1], preferred_element_type=f32)
             + jnp.dot(g_u * g_r,       fw1[2], preferred_element_type=f32)
             + jnp.dot(jnp.abs(g_u - g_r), fw1[3], preferred_element_type=f32)
             + ffn_b1)
        z = jnp.maximum(z, 0.0)
        logits = jnp.dot(z, fw2, preferred_element_type=f32) + ffn_b2            # [T,1]

        # forward(): ps = sum_t p_t ; p = sigmoid(ps)
        ps = jnp.sum(logits, axis=0, keepdims=True)                              # [1,1]
        p = 1.0 / (1.0 + jnp.exp(-ps))
        out_ref[i] = jnp.broadcast_to(p, (8, 128))


def _normalize_adj(adj):
    """GCNConv-style symmetric normalization: D^-1/2 (A + I) D^-1/2."""
    s = adj.shape[-1]
    a = adj + jnp.eye(s, dtype=adj.dtype)
    deg = jnp.sum(a, axis=-1)
    dinv = jax.lax.rsqrt(deg)
    return a * dinv[..., :, None] * dinv[..., None, :]


def _block_diag_adj(a_u, a_r):
    """Block-diagonal [(T+1)S, (T+1)S] adjacency: T utterance blocks + response block."""
    b = a_u.shape[0]
    out = jnp.zeros((b, N_STACK, N_STACK), jnp.float32)
    for t in range(TURN_NUM):
        r0 = t * SEQ_LEN
        out = out.at[:, r0:r0 + SEQ_LEN, r0:r0 + SEQ_LEN].set(a_u[:, t])
    r0 = TURN_NUM * SEQ_LEN
    out = out.at[:, r0:r0 + SEQ_LEN, r0:r0 + SEQ_LEN].set(a_r)
    return out


def _pack_params(params):
    """Pack the small weight/bias tensors into one [PACK_ROWS, 128] slab."""
    t1 = TURN_NUM + 1
    slab = jnp.zeros((PACK_ROWS, 128), jnp.float32)
    slab = slab.at[GCNW_R:GCNW_R + EMB_DIM, 0:GCN_OUT].set(params["gcn_w"])
    slab = slab.at[CW_R:CW_R + EMB_DIM, 0:GCN_OUT].set(params["cross_w"])
    attn = params["attention_coef"]
    for t in range(t1):                      # block-diag attention
        r0 = ATTN_R + t * SEQ_LEN
        slab = slab.at[r0:r0 + SEQ_LEN, t * SEQ_LEN:(t + 1) * SEQ_LEN].set(attn)
    slab = slab.at[AWT_R:AWT_R + t1 * SEQ_LEN, 0:GCN_OUT].set(
        jnp.tile(params["assign_weight"], (t1, 1)))
    slab = slab.at[W1S_R:W1S_R + GCN_OUT, 0:MP_HID].set(params["mp_w1"][1:])
    slab = slab.at[W2_R:W2_R + MP_HID, 0:MP_HID].set(params["mp_w2"])
    for k in range(4):                       # 8-aligned row-blocks of ffn_w1
        r0 = FW1_R + k * FW1_STRIDE
        slab = slab.at[r0:r0 + MP_HID, 0:FFN_HID].set(
            params["ffn_w1"][k * MP_HID:(k + 1) * MP_HID])
    slab = slab.at[FW2_R:FW2_R + FFN_HID, 0:1].set(params["ffn_w2"])
    slab = slab.at[BIAS_R + 0, 0:GCN_OUT].set(params["gcn_b"][0])
    slab = slab.at[BIAS_R + 1, 0:MP_HID].set(params["mp_b1"][0])
    slab = slab.at[BIAS_R + 2, 0:MP_HID].set(params["mp_b2"][0])
    slab = slab.at[BIAS_R + 3, 0:FFN_HID].set(params["ffn_b1"][0])
    slab = slab.at[BIAS_R + 4, 0:1].set(params["ffn_b2"][0])
    slab = slab.at[BIAS_R + 5, 0:MP_HID].set(params["mp_w1"][0])
    return slab


def _batch_block(batch):
    """v7x (2 TensorCores/chip): one batch element per grid step so the batch
    axis shards across cores. Single-TC chips (v5e/v6e): fold the whole batch
    into a single grid step to avoid per-step pipeline overhead."""
    try:
        kind = jax.devices()[0].device_kind.lower()
    except Exception:
        return batch
    if "v7" in kind or "7x" in kind:
        return 1
    return batch


def gmn_pallas(context_ids, response_ids, context_adjs, response_adj, params):
    emb = params["embedding"]
    u_emb = emb[context_ids].astype(jnp.float32)    # [B, T, S, D]
    r_emb = emb[response_ids].astype(jnp.float32)   # [B, S, D]
    B, T, S, D = u_emb.shape

    # wrapper-side stacking: [u_0; ...; u_{T-1}; r] along the sequence axis
    x = jnp.concatenate([u_emb.reshape(B, T * S, D), r_emb], axis=1)   # [B,(T+1)S,D]

    a_u = _normalize_adj(context_adjs)              # [B, T, S, S]
    a_r = _normalize_adj(response_adj)              # [B, S, S]
    a_bd = _block_diag_adj(a_u, a_r)                # [B, (T+1)S, (T+1)S]

    slab = _pack_params(params)                     # [PACK_ROWS, 128]

    bb = _batch_block(B)
    if B % bb != 0:
        bb = 1
    grid = (B // bb,)

    grid_spec = pltpu.PrefetchScalarGridSpec(
        num_scalar_prefetch=0,
        grid=grid,
        in_specs=[
            pl.BlockSpec((bb, N_STACK, D), lambda b: (b, 0, 0)),        # stacked embeddings
            pl.BlockSpec((bb, N_STACK, N_STACK), lambda b: (b, 0, 0)),  # block-diag adjacency
            pl.BlockSpec((PACK_ROWS, 128), lambda b: (0, 0)),           # packed weight slab
        ],
        out_specs=pl.BlockSpec((bb, 8, 128), lambda b: (b, 0, 0)),
    )

    out_pad = pl.pallas_call(
        gmn_kernel,
        out_shape=jax.ShapeDtypeStruct((B, 8, 128), jnp.float32),
        grid_spec=grid_spec,
        compiler_params=pltpu.CompilerParams(
            dimension_semantics=("parallel",)),
    )(x, a_bd, slab)

    # Per-batch probability sigmoid(sum_t p_t) already computed in-kernel.
    return out_pad[:, 0, 0:1]                       # [B, 1]


def init_params(key):
    ks = jax.random.split(key, 12)
    u = lambda k, shape: jax.random.uniform(k, shape, jnp.float32)
    n = lambda k, shape, s: jax.random.normal(k, shape, jnp.float32) * s
    return {
        "embedding":      n(ks[0], (VOCAB_SIZE, EMB_DIM), 0.02),
        "gcn_w":          n(ks[1], (EMB_DIM, GCN_OUT), 0.1),
        "gcn_b":          jnp.zeros((1, GCN_OUT), jnp.float32),
        "cross_w":        u(ks[2], (EMB_DIM, GCN_OUT)),        # torch.rand
        "attention_coef": u(ks[3], (SEQ_LEN, SEQ_LEN)),        # torch.rand
        "assign_weight":  u(ks[4], (SEQ_LEN, GCN_OUT)),        # torch.rand
        "mp_w1":          n(ks[5], (GCN_OUT + 1, MP_HID), 0.1),
        "mp_b1":          n(ks[6], (1, MP_HID), 0.1),
        "mp_w2":          n(ks[7], (MP_HID, MP_HID), 0.1),
        "mp_b2":          n(ks[8], (1, MP_HID), 0.1),
        "ffn_w1":         n(ks[9], (4 * MP_HID, FFN_HID), 0.1),
        "ffn_b1":         n(ks[10], (1, FFN_HID), 0.1),
        "ffn_w2":         n(ks[11], (FFN_HID, 1), 0.1),
        "ffn_b2":         jnp.zeros((1, 1), jnp.float32),
    }


if __name__ == "__main__":
    key = jax.random.PRNGKey(0)
    kp, k1, k2, k3, k4 = jax.random.split(key, 5)
    params = init_params(kp)

    context_ids = jax.random.randint(k1, (BATCH, TURN_NUM, SEQ_LEN), 0, VOCAB_SIZE)
    response_ids = jax.random.randint(k2, (BATCH, SEQ_LEN), 0, VOCAB_SIZE)

    ca = jax.random.bernoulli(k3, 0.3, (BATCH, TURN_NUM, SEQ_LEN, SEQ_LEN))
    ca = ca.astype(jnp.float32)
    context_adjs = jnp.maximum(ca, jnp.swapaxes(ca, -1, -2))     # symmetric 0/1 adj

    ra = jax.random.bernoulli(k4, 0.3, (BATCH, SEQ_LEN, SEQ_LEN)).astype(jnp.float32)
    response_adj = jnp.maximum(ra, jnp.swapaxes(ra, -1, -2))

    out = gmn_pallas(context_ids, response_ids, context_adjs, response_adj, params)
    jax.block_until_ready(out)
    assert out.shape == (BATCH, 1), out.shape
    print("KERNEL_OK")
</pallas_src>

<mosaic_0001>
module attributes {stable_mosaic.version = 11 : i64} {
  func.func @gmn_kernel(%arg0: i32, %arg1: memref<2x64x32xf32, #tpu.memory_space<vmem>>, %arg2: memref<2x64x64xf32, #tpu.memory_space<vmem>>, %arg3: memref<376x128xf32, #tpu.memory_space<vmem>>, %arg4: memref<2x8x128xf32, #tpu.memory_space<vmem>>) attributes {dimension_semantics = [#tpu.dimension_semantics<parallel>], iteration_bounds = array<i64: 1>, scalar_prefetch = 0 : i64, scratch_operands = 0 : i64, tpu.core_type = #tpu.core_type<tc>, window_params = [{transform_indices = @transform_0, window_bounds = array<i64: 2, 64, 32>}, {transform_indices = @transform_1, window_bounds = array<i64: 2, 64, 64>}, {pipeline_mode = #tpu.pipeline_mode<synchronous>, transform_indices = @transform_2, window_bounds = array<i64: 376, 128>}, {transform_indices = @transform_3, window_bounds = array<i64: 2, 8, 128>}]} {
    %c0 = arith.constant 0 : index
    %c0_0 = arith.constant 0 : index
    %0 = vector.load %arg3[%c0, %c0_0] : memref<376x128xf32, #tpu.memory_space<vmem>>, vector<32x10xf32>
    %c32 = arith.constant 32 : index
    %c0_1 = arith.constant 0 : index
    %1 = vector.load %arg3[%c32, %c0_1] : memref<376x128xf32, #tpu.memory_space<vmem>>, vector<32x10xf32>
    %c64 = arith.constant 64 : index
    %c0_2 = arith.constant 0 : index
    %2 = vector.load %arg3[%c64, %c0_2] : memref<376x128xf32, #tpu.memory_space<vmem>>, vector<64x64xf32>
    %c128 = arith.constant 128 : index
    %c0_3 = arith.constant 0 : index
    %3 = vector.load %arg3[%c128, %c0_3] : memref<376x128xf32, #tpu.memory_space<vmem>>, vector<64x10xf32>
    %c192 = arith.constant 192 : index
    %c0_4 = arith.constant 0 : index
    %4 = vector.load %arg3[%c192, %c0_4] : memref<376x128xf32, #tpu.memory_space<vmem>>, vector<10x20xf32>
    %c208 = arith.constant 208 : index
    %c0_5 = arith.constant 0 : index
    %5 = vector.load %arg3[%c208, %c0_5] : memref<376x128xf32, #tpu.memory_space<vmem>>, vector<20x20xf32>
    %c232 = arith.constant 232 : index
    %c0_6 = arith.constant 0 : index
    %6 = vector.load %arg3[%c232, %c0_6] : memref<376x128xf32, #tpu.memory_space<vmem>>, vector<20x40xf32>
    %c256 = arith.constant 256 : index
    %c0_7 = arith.constant 0 : index
    %7 = vector.load %arg3[%c256, %c0_7] : memref<376x128xf32, #tpu.memory_space<vmem>>, vector<20x40xf32>
    %c280 = arith.constant 280 : index
    %c0_8 = arith.constant 0 : index
    %8 = vector.load %arg3[%c280, %c0_8] : memref<376x128xf32, #tpu.memory_space<vmem>>, vector<20x40xf32>
    %c304 = arith.constant 304 : index
    %c0_9 = arith.constant 0 : index
    %9 = vector.load %arg3[%c304, %c0_9] : memref<376x128xf32, #tpu.memory_space<vmem>>, vector<20x40xf32>
    %c328 = arith.constant 328 : index
    %c0_10 = arith.constant 0 : index
    %10 = vector.load %arg3[%c328, %c0_10] : memref<376x128xf32, #tpu.memory_space<vmem>>, vector<40x1xf32>
    %c368 = arith.constant 368 : index
    %c0_11 = arith.constant 0 : index
    %11 = vector.load %arg3[%c368, %c0_11] : memref<376x128xf32, #tpu.memory_space<vmem>>, vector<1x10xf32>
    %c369 = arith.constant 369 : index
    %c0_12 = arith.constant 0 : index
    %12 = vector.load %arg3[%c369, %c0_12] : memref<376x128xf32, #tpu.memory_space<vmem>>, vector<1x20xf32>
    %c370 = arith.constant 370 : index
    %c0_13 = arith.constant 0 : index
    %13 = vector.load %arg3[%c370, %c0_13] : memref<376x128xf32, #tpu.memory_space<vmem>>, vector<1x20xf32>
    %c371 = arith.constant 371 : index
    %c0_14 = arith.constant 0 : index
    %14 = vector.load %arg3[%c371, %c0_14] : memref<376x128xf32, #tpu.memory_space<vmem>>, vector<1x40xf32>
    %c372 = arith.constant 372 : index
    %c0_15 = arith.constant 0 : index
    %15 = vector.load %arg3[%c372, %c0_15] : memref<376x128xf32, #tpu.memory_space<vmem>>, vector<1x1xf32>
    %c373 = arith.constant 373 : index
    %c0_16 = arith.constant 0 : index
    %16 = vector.load %arg3[%c373, %c0_16] : memref<376x128xf32, #tpu.memory_space<vmem>>, vector<1x20xf32>
    %c0_17 = arith.constant 0 : index
    %c0_18 = arith.constant 0 : index
    %c0_19 = arith.constant 0 : index
    %17 = vector.load %arg1[%c0_17, %c0_18, %c0_19] : memref<2x64x32xf32, #tpu.memory_space<vmem>>, vector<1x64x32xf32>
    %18 = vector.shape_cast %17 : vector<1x64x32xf32> to vector<64x32xf32>
    %c0_20 = arith.constant 0 : index
    %c0_21 = arith.constant 0 : index
    %c0_22 = arith.constant 0 : index
    %19 = vector.load %arg2[%c0_20, %c0_21, %c0_22] : memref<2x64x64xf32, #tpu.memory_space<vmem>>, vector<1x64x64xf32>
    %20 = vector.shape_cast %19 : vector<1x64x64xf32> to vector<64x64xf32>
    %cst = arith.constant dense<0.000000e+00> : vector<64x10xf32>
    %21 = tpu.matmul %18, %0, %cst {dimension_numbers = #tpu.dot_dimension_numbers<[1], [0], [0], [1], [0, 0, 1, 1], [], []>} : vector<64x32xf32>, vector<32x10xf32>, vector<64x10xf32> -> vector<64x10xf32>
    %cst_23 = arith.constant dense<0.000000e+00> : vector<64x10xf32>
    %22 = tpu.matmul %18, %1, %cst_23 {dimension_numbers = #tpu.dot_dimension_numbers<[1], [0], [0], [1], [0, 0, 1, 1], [], []>} : vector<64x32xf32>, vector<32x10xf32>, vector<64x10xf32> -> vector<64x10xf32>
    %cst_24 = arith.constant dense<0.000000e+00> : vector<64x10xf32>
    %23 = tpu.matmul %20, %21, %cst_24 {dimension_numbers = #tpu.dot_dimension_numbers<[1], [0], [0], [1], [0, 0, 1, 1], [], []>} : vector<64x64xf32>, vector<64x10xf32>, vector<64x10xf32> -> vector<64x10xf32>
    %24 = vector.broadcast %11 : vector<1x10xf32> to vector<64x10xf32>
    %25 = arith.addf %23, %24 : vector<64x10xf32>
    %cst_25 = arith.constant dense<0.000000e+00> : vector<64x10xf32>
    %26 = tpu.matmul %2, %22, %cst_25 {dimension_numbers = #tpu.dot_dimension_numbers<[1], [0], [0], [1], [0, 0, 1, 1], [], []>} : vector<64x64xf32>, vector<64x10xf32>, vector<64x10xf32> -> vector<64x10xf32>
    %27 = arith.mulf %3, %25 : vector<64x10xf32>
    %28 = arith.mulf %3, %26 : vector<64x10xf32>
    %29 = arith.mulf %27, %27 : vector<64x10xf32>
    %cst_26 = arith.constant dense<0.000000e+00> : vector<64xf32>
    %30 = vector.multi_reduction <add>, %29, %cst_26 [1] : vector<64x10xf32> to vector<64xf32>
    %31 = vector.shape_cast %30 : vector<64xf32> to vector<64x1xf32>
    %32 = arith.mulf %28, %28 : vector<64x10xf32>
    %cst_27 = arith.constant dense<0.000000e+00> : vector<64xf32>
    %33 = vector.multi_reduction <add>, %32, %cst_27 [1] : vector<64x10xf32> to vector<64xf32>
    %34 = vector.shape_cast %33 : vector<64xf32> to vector<64x1xf32>
    %35 = vector.extract_strided_slice %27 {offsets = [0, 0], sizes = [48, 10], strides = [1, 1]} : vector<64x10xf32> to vector<48x10xf32>
    %36 = vector.extract_strided_slice %27 {offsets = [48, 0], sizes = [16, 10], strides = [1, 1]} : vector<64x10xf32> to vector<16x10xf32>
    %37 = vector.extract_strided_slice %28 {offsets = [0, 0], sizes = [48, 10], strides = [1, 1]} : vector<64x10xf32> to vector<48x10xf32>
    %38 = vector.extract_strided_slice %28 {offsets = [48, 0], sizes = [16, 10], strides = [1, 1]} : vector<64x10xf32> to vector<16x10xf32>
    %39 = tpu.concatenate %38, %38, %38 in 0 : vector<16x10xf32>, vector<16x10xf32>, vector<16x10xf32> -> vector<48x10xf32>
    %40 = arith.mulf %35, %39 : vector<48x10xf32>
    %cst_28 = arith.constant dense<0.000000e+00> : vector<48xf32>
    %41 = vector.multi_reduction <add>, %40, %cst_28 [1] : vector<48x10xf32> to vector<48xf32>
    %42 = vector.shape_cast %41 : vector<48xf32> to vector<48x1xf32>
    %43 = tpu.concatenate %36, %36, %36 in 0 : vector<16x10xf32>, vector<16x10xf32>, vector<16x10xf32> -> vector<48x10xf32>
    %44 = arith.mulf %43, %37 : vector<48x10xf32>
    %cst_29 = arith.constant dense<0.000000e+00> : vector<48xf32>
    %45 = vector.multi_reduction <add>, %44, %cst_29 [1] : vector<48x10xf32> to vector<48xf32>
    %46 = vector.shape_cast %45 : vector<48xf32> to vector<48x1xf32>
    %47 = vector.extract_strided_slice %31 {offsets = [0, 0], sizes = [48, 1], strides = [1, 1]} : vector<64x1xf32> to vector<48x1xf32>
    %cst_30 = arith.constant 1.000000e-16 : f32
    %48 = vector.broadcast %cst_30 : f32 to vector<48x1xf32>
    %49 = arith.maximumf %47, %48 : vector<48x1xf32>
    %50 = math.rsqrt %49 : vector<48x1xf32>
    %51 = vector.extract_strided_slice %34 {offsets = [48, 0], sizes = [16, 1], strides = [1, 1]} : vector<64x1xf32> to vector<16x1xf32>
    %52 = tpu.concatenate %51, %51, %51 in 0 : vector<16x1xf32>, vector<16x1xf32>, vector<16x1xf32> -> vector<48x1xf32>
    %cst_31 = arith.constant 1.000000e-16 : f32
    %53 = vector.broadcast %cst_31 : f32 to vector<48x1xf32>
    %54 = arith.maximumf %52, %53 : vector<48x1xf32>
    %55 = math.rsqrt %54 : vector<48x1xf32>
    %56 = arith.mulf %50, %55 : vector<48x1xf32>
    %57 = vector.extract_strided_slice %31 {offsets = [48, 0], sizes = [16, 1], strides = [1, 1]} : vector<64x1xf32> to vector<16x1xf32>
    %58 = tpu.concatenate %57, %57, %57 in 0 : vector<16x1xf32>, vector<16x1xf32>, vector<16x1xf32> -> vector<48x1xf32>
    %cst_32 = arith.constant 1.000000e-16 : f32
    %59 = vector.broadcast %cst_32 : f32 to vector<48x1xf32>
    %60 = arith.maximumf %58, %59 : vector<48x1xf32>
    %61 = math.rsqrt %60 : vector<48x1xf32>
    %62 = vector.extract_strided_slice %34 {offsets = [0, 0], sizes = [48, 1], strides = [1, 1]} : vector<64x1xf32> to vector<48x1xf32>
    %cst_33 = arith.constant 1.000000e-16 : f32
    %63 = vector.broadcast %cst_33 : f32 to vector<48x1xf32>
    %64 = arith.maximumf %62, %63 : vector<48x1xf32>
    %65 = math.rsqrt %64 : vector<48x1xf32>
    %66 = arith.mulf %61, %65 : vector<48x1xf32>
    %67 = arith.mulf %42, %56 : vector<48x1xf32>
    %68 = arith.mulf %46, %66 : vector<48x1xf32>
    %cst_34 = arith.constant dense<0.000000e+00> : vector<64x20xf32>
    %69 = tpu.matmul %25, %4, %cst_34 {dimension_numbers = #tpu.dot_dimension_numbers<[1], [0], [0], [1], [0, 0, 1, 1], [], []>} : vector<64x10xf32>, vector<10x20xf32>, vector<64x20xf32> -> vector<64x20xf32>
    %70 = vector.broadcast %12 : vector<1x20xf32> to vector<64x20xf32>
    %71 = arith.addf %69, %70 : vector<64x20xf32>
    %72 = vector.broadcast %67 : vector<48x1xf32> to vector<48x20xf32>
    %73 = vector.broadcast %16 : vector<1x20xf32> to vector<48x20xf32>
    %74 = arith.mulf %72, %73 : vector<48x20xf32>
    %75 = vector.extract_strided_slice %71 {offsets = [0, 0], sizes = [48, 20], strides = [1, 1]} : vector<64x20xf32> to vector<48x20xf32>
    %76 = arith.addf %74, %75 : vector<48x20xf32>
    %cst_35 = arith.constant 0.000000e+00 : f32
    %77 = vector.broadcast %cst_35 : f32 to vector<48x20xf32>
    %78 = arith.maximumf %76, %77 : vector<48x20xf32>
    %79 = vector.broadcast %68 : vector<48x1xf32> to vector<48x20xf32>
    %80 = vector.broadcast %16 : vector<1x20xf32> to vector<48x20xf32>
    %81 = arith.mulf %79, %80 : vector<48x20xf32>
    %82 = vector.extract_strided_slice %71 {offsets = [48, 0], sizes = [16, 20], strides = [1, 1]} : vector<64x20xf32> to vector<16x20xf32>
    %83 = tpu.concatenate %82, %82, %82 in 0 : vector<16x20xf32>, vector<16x20xf32>, vector<16x20xf32> -> vector<48x20xf32>
    %84 = arith.addf %81, %83 : vector<48x20xf32>
    %cst_36 = arith.constant 0.000000e+00 : f32
    %85 = vector.broadcast %cst_36 : f32 to vector<48x20xf32>
    %86 = arith.maximumf %84, %85 : vector<48x20xf32>
    %cst_37 = arith.constant dense<0.000000e+00> : vector<48x20xf32>
    %87 = tpu.matmul %78, %5, %cst_37 {dimension_numbers = #tpu.dot_dimension_numbers<[1], [0], [0], [1], [0, 0, 1, 1], [], []>} : vector<48x20xf32>, vector<20x20xf32>, vector<48x20xf32> -> vector<48x20xf32>
    %88 = vector.broadcast %13 : vector<1x20xf32> to vector<48x20xf32>
    %89 = arith.addf %87, %88 : vector<48x20xf32>
    %cst_38 = arith.constant dense<0.000000e+00> : vector<48x20xf32>
    %90 = tpu.matmul %86, %5, %cst_38 {dimension_numbers = #tpu.dot_dimension_numbers<[1], [0], [0], [1], [0, 0, 1, 1], [], []>} : vector<48x20xf32>, vector<20x20xf32>, vector<48x20xf32> -> vector<48x20xf32>
    %91 = vector.broadcast %13 : vector<1x20xf32> to vector<48x20xf32>
    %92 = arith.addf %90, %91 : vector<48x20xf32>
    %93 = vector.shape_cast %89 : vector<48x20xf32> to vector<3x16x20xf32>
    %cst_39 = arith.constant dense<0xFF800000> : vector<3x20xf32>
    %94 = vector.multi_reduction <maximumf>, %93, %cst_39 [1] : vector<3x16x20xf32> to vector<3x20xf32>
    %95 = vector.shape_cast %92 : vector<48x20xf32> to vector<3x16x20xf32>
    %cst_40 = arith.constant dense<0xFF800000> : vector<3x20xf32>
    %96 = vector.multi_reduction <maximumf>, %95, %cst_40 [1] : vector<3x16x20xf32> to vector<3x20xf32>
    %cst_41 = arith.constant dense<0.000000e+00> : vector<3x40xf32>
    %97 = tpu.matmul %94, %6, %cst_41 {dimension_numbers = #tpu.dot_dimension_numbers<[1], [0], [0], [1], [0, 0, 1, 1], [], []>} : vector<3x20xf32>, vector<20x40xf32>, vector<3x40xf32> -> vector<3x40xf32>
    %cst_42 = arith.constant dense<0.000000e+00> : vector<3x40xf32>
    %98 = tpu.matmul %96, %7, %cst_42 {dimension_numbers = #tpu.dot_dimension_numbers<[1], [0], [0], [1], [0, 0, 1, 1], [], []>} : vector<3x20xf32>, vector<20x40xf32>, vector<3x40xf32> -> vector<3x40xf32>
    %99 = arith.addf %97, %98 : vector<3x40xf32>
    %100 = arith.mulf %94, %96 : vector<3x20xf32>
    %cst_43 = arith.constant dense<0.000000e+00> : vector<3x40xf32>
    %101 = tpu.matmul %100, %8, %cst_43 {dimension_numbers = #tpu.dot_dimension_numbers<[1], [0], [0], [1], [0, 0, 1, 1], [], []>} : vector<3x20xf32>, vector<20x40xf32>, vector<3x40xf32> -> vector<3x40xf32>
    %102 = arith.addf %99, %101 : vector<3x40xf32>
    %103 = arith.subf %94, %96 : vector<3x20xf32>
    %104 = math.absf %103 : vector<3x20xf32>
    %cst_44 = arith.constant dense<0.000000e+00> : vector<3x40xf32>
    %105 = tpu.matmul %104, %9, %cst_44 {dimension_numbers = #tpu.dot_dimension_numbers<[1], [0], [0], [1], [0, 0, 1, 1], [], []>} : vector<3x20xf32>, vector<20x40xf32>, vector<3x40xf32> -> vector<3x40xf32>
    %106 = arith.addf %102, %105 : vector<3x40xf32>
    %107 = vector.broadcast %14 : vector<1x40xf32> to vector<3x40xf32>
    %108 = arith.addf %106, %107 : vector<3x40xf32>
    %cst_45 = arith.constant 0.000000e+00 : f32
    %109 = vector.broadcast %cst_45 : f32 to vector<3x40xf32>
    %110 = arith.maximumf %108, %109 : vector<3x40xf32>
    %cst_46 = arith.constant dense<0.000000e+00> : vector<3x1xf32>
    %111 = tpu.matmul %110, %10, %cst_46 {dimension_numbers = #tpu.dot_dimension_numbers<[1], [0], [0], [1], [0, 0, 1, 1], [], []>} : vector<3x40xf32>, vector<40x1xf32>, vector<3x1xf32> -> vector<3x1xf32>
    %112 = vector.broadcast %15 : vector<1x1xf32> to vector<3x1xf32>
    %113 = arith.addf %111, %112 : vector<3x1xf32>
    %cst_47 = arith.constant dense<0.000000e+00> : vector<1xf32>
    %114 = vector.multi_reduction <add>, %113, %cst_47 [0] : vector<3x1xf32> to vector<1xf32>
    %115 = vector.shape_cast %114 : vector<1xf32> to vector<1x1xf32>
    %cst_48 = arith.constant 0.000000e+00 : f32
    %116 = vector.broadcast %cst_48 : f32 to vector<1x1xf32>
    %117 = arith.subf %116, %115 : vector<1x1xf32>
    %118 = math.exp %117 : vector<1x1xf32>
    %cst_49 = arith.constant 1.000000e+00 : f32
    %119 = vector.broadcast %cst_49 : f32 to vector<1x1xf32>
    %120 = arith.addf %119, %118 : vector<1x1xf32>
    %cst_50 = arith.constant 1.000000e+00 : f32
    %121 = vector.broadcast %cst_50 : f32 to vector<1x1xf32>
    %122 = arith.divf %121, %120 : vector<1x1xf32>
    %123 = vector.shape_cast %122 : vector<1x1xf32> to vector<1x1xf32>
    %124 = vector.broadcast %123 : vector<1x1xf32> to vector<8x128xf32>
    %c0_51 = arith.constant 0 : index
    %c0_52 = arith.constant 0 : index
    %c0_53 = arith.constant 0 : index
    %125 = vector.load %arg4[%c0_51, %c0_52, %c0_53] : memref<2x8x128xf32, #tpu.memory_space<vmem>>, vector<1x8x128xf32>
    %126 = vector.shape_cast %125 : vector<1x8x128xf32> to vector<8x128xf32>
    %127 = vector.shape_cast %124 : vector<8x128xf32> to vector<1x8x128xf32>
    tpu.vector_store %arg4[%c0_51, %c0_52, %c0_53], %127 {strides = array<i32>} : memref<2x8x128xf32, #tpu.memory_space<vmem>>, vector<1x8x128xf32>,
    %c1 = arith.constant 1 : index
    %c0_54 = arith.constant 0 : index
    %c0_55 = arith.constant 0 : index
    %128 = vector.load %arg1[%c1, %c0_54, %c0_55] : memref<2x64x32xf32, #tpu.memory_space<vmem>>, vector<1x64x32xf32>
    %129 = vector.shape_cast %128 : vector<1x64x32xf32> to vector<64x32xf32>
    %c1_56 = arith.constant 1 : index
    %c0_57 = arith.constant 0 : index
    %c0_58 = arith.constant 0 : index
    %130 = vector.load %arg2[%c1_56, %c0_57, %c0_58] : memref<2x64x64xf32, #tpu.memory_space<vmem>>, vector<1x64x64xf32>
    %131 = vector.shape_cast %130 : vector<1x64x64xf32> to vector<64x64xf32>
    %cst_59 = arith.constant dense<0.000000e+00> : vector<64x10xf32>
    %132 = tpu.matmul %129, %0, %cst_59 {dimension_numbers = #tpu.dot_dimension_numbers<[1], [0], [0], [1], [0, 0, 1, 1], [], []>} : vector<64x32xf32>, vector<32x10xf32>, vector<64x10xf32> -> vector<64x10xf32>
    %cst_60 = arith.constant dense<0.000000e+00> : vector<64x10xf32>
    %133 = tpu.matmul %129, %1, %cst_60 {dimension_numbers = #tpu.dot_dimension_numbers<[1], [0], [0], [1], [0, 0, 1, 1], [], []>} : vector<64x32xf32>, vector<32x10xf32>, vector<64x10xf32> -> vector<64x10xf32>
    %cst_61 = arith.constant dense<0.000000e+00> : vector<64x10xf32>
    %134 = tpu.matmul %131, %132, %cst_61 {dimension_numbers = #tpu.dot_dimension_numbers<[1], [0], [0], [1], [0, 0, 1, 1], [], []>} : vector<64x64xf32>, vector<64x10xf32>, vector<64x10xf32> -> vector<64x10xf32>
    %135 = vector.broadcast %11 : vector<1x10xf32> to vector<64x10xf32>
    %136 = arith.addf %134, %135 : vector<64x10xf32>
    %cst_62 = arith.constant dense<0.000000e+00> : vector<64x10xf32>
    %137 = tpu.matmul %2, %133, %cst_62 {dimension_numbers = #tpu.dot_dimension_numbers<[1], [0], [0], [1], [0, 0, 1, 1], [], []>} : vector<64x64xf32>, vector<64x10xf32>, vector<64x10xf32> -> vector<64x10xf32>
    %138 = arith.mulf %3, %136 : vector<64x10xf32>
    %139 = arith.mulf %3, %137 : vector<64x10xf32>
    %140 = arith.mulf %138, %138 : vector<64x10xf32>
    %cst_63 = arith.constant dense<0.000000e+00> : vector<64xf32>
    %141 = vector.multi_reduction <add>, %140, %cst_63 [1] : vector<64x10xf32> to vector<64xf32>
    %142 = vector.shape_cast %141 : vector<64xf32> to vector<64x1xf32>
    %143 = arith.mulf %139, %139 : vector<64x10xf32>
    %cst_64 = arith.constant dense<0.000000e+00> : vector<64xf32>
    %144 = vector.multi_reduction <add>, %143, %cst_64 [1] : vector<64x10xf32> to vector<64xf32>
    %145 = vector.shape_cast %144 : vector<64xf32> to vector<64x1xf32>
    %146 = vector.extract_strided_slice %138 {offsets = [0, 0], sizes = [48, 10], strides = [1, 1]} : vector<64x10xf32> to vector<48x10xf32>
    %147 = vector.extract_strided_slice %138 {offsets = [48, 0], sizes = [16, 10], strides = [1, 1]} : vector<64x10xf32> to vector<16x10xf32>
    %148 = vector.extract_strided_slice %139 {offsets = [0, 0], sizes = [48, 10], strides = [1, 1]} : vector<64x10xf32> to vector<48x10xf32>
    %149 = vector.extract_strided_slice %139 {offsets = [48, 0], sizes = [16, 10], strides = [1, 1]} : vector<64x10xf32> to vector<16x10xf32>
    %150 = tpu.concatenate %149, %149, %149 in 0 : vector<16x10xf32>, vector<16x10xf32>, vector<16x10xf32> -> vector<48x10xf32>
    %151 = arith.mulf %146, %150 : vector<48x10xf32>
    %cst_65 = arith.constant dense<0.000000e+00> : vector<48xf32>
    %152 = vector.multi_reduction <add>, %151, %cst_65 [1] : vector<48x10xf32> to vector<48xf32>
    %153 = vector.shape_cast %152 : vector<48xf32> to vector<48x1xf32>
    %154 = tpu.concatenate %147, %147, %147 in 0 : vector<16x10xf32>, vector<16x10xf32>, vector<16x10xf32> -> vector<48x10xf32>
    %155 = arith.mulf %154, %148 : vector<48x10xf32>
    %cst_66 = arith.constant dense<0.000000e+00> : vector<48xf32>
    %156 = vector.multi_reduction <add>, %155, %cst_66 [1] : vector<48x10xf32> to vector<48xf32>
    %157 = vector.shape_cast %156 : vector<48xf32> to vector<48x1xf32>
    %158 = vector.extract_strided_slice %142 {offsets = [0, 0], sizes = [48, 1], strides = [1, 1]} : vector<64x1xf32> to vector<48x1xf32>
    %cst_67 = arith.constant 1.000000e-16 : f32
    %159 = vector.broadcast %cst_67 : f32 to vector<48x1xf32>
    %160 = arith.maximumf %158, %159 : vector<48x1xf32>
    %161 = math.rsqrt %160 : vector<48x1xf32>
    %162 = vector.extract_strided_slice %145 {offsets = [48, 0], sizes = [16, 1], strides = [1, 1]} : vector<64x1xf32> to vector<16x1xf32>
    %163 = tpu.concatenate %162, %162, %162 in 0 : vector<16x1xf32>, vector<16x1xf32>, vector<16x1xf32> -> vector<48x1xf32>
    %cst_68 = arith.constant 1.000000e-16 : f32
    %164 = vector.broadcast %cst_68 : f32 to vector<48x1xf32>
    %165 = arith.maximumf %163, %164 : vector<48x1xf32>
    %166 = math.rsqrt %165 : vector<48x1xf32>
    %167 = arith.mulf %161, %166 : vector<48x1xf32>
    %168 = vector.extract_strided_slice %142 {offsets = [48, 0], sizes = [16, 1], strides = [1, 1]} : vector<64x1xf32> to vector<16x1xf32>
    %169 = tpu.concatenate %168, %168, %168 in 0 : vector<16x1xf32>, vector<16x1xf32>, vector<16x1xf32> -> vector<48x1xf32>
    %cst_69 = arith.constant 1.000000e-16 : f32
    %170 = vector.broadcast %cst_69 : f32 to vector<48x1xf32>
    %171 = arith.maximumf %169, %170 : vector<48x1xf32>
    %172 = math.rsqrt %171 : vector<48x1xf32>
    %173 = vector.extract_strided_slice %145 {offsets = [0, 0], sizes = [48, 1], strides = [1, 1]} : vector<64x1xf32> to vector<48x1xf32>
    %cst_70 = arith.constant 1.000000e-16 : f32
    %174 = vector.broadcast %cst_70 : f32 to vector<48x1xf32>
    %175 = arith.maximumf %173, %174 : vector<48x1xf32>
    %176 = math.rsqrt %175 : vector<48x1xf32>
    %177 = arith.mulf %172, %176 : vector<48x1xf32>
    %178 = arith.mulf %153, %167 : vector<48x1xf32>
    %179 = arith.mulf %157, %177 : vector<48x1xf32>
    %cst_71 = arith.constant dense<0.000000e+00> : vector<64x20xf32>
    %180 = tpu.matmul %136, %4, %cst_71 {dimension_numbers = #tpu.dot_dimension_numbers<[1], [0], [0], [1], [0, 0, 1, 1], [], []>} : vector<64x10xf32>, vector<10x20xf32>, vector<64x20xf32> -> vector<64x20xf32>
    %181 = vector.broadcast %12 : vector<1x20xf32> to vector<64x20xf32>
    %182 = arith.addf %180, %181 : vector<64x20xf32>
    %183 = vector.broadcast %178 : vector<48x1xf32> to vector<48x20xf32>
    %184 = vector.broadcast %16 : vector<1x20xf32> to vector<48x20xf32>
    %185 = arith.mulf %183, %184 : vector<48x20xf32>
    %186 = vector.extract_strided_slice %182 {offsets = [0, 0], sizes = [48, 20], strides = [1, 1]} : vector<64x20xf32> to vector<48x20xf32>
    %187 = arith.addf %185, %186 : vector<48x20xf32>
    %cst_72 = arith.constant 0.000000e+00 : f32
    %188 = vector.broadcast %cst_72 : f32 to vector<48x20xf32>
    %189 = arith.maximumf %187, %188 : vector<48x20xf32>
    %190 = vector.broadcast %179 : vector<48x1xf32> to vector<48x20xf32>
    %191 = vector.broadcast %16 : vector<1x20xf32> to vector<48x20xf32>
    %192 = arith.mulf %190, %191 : vector<48x20xf32>
    %193 = vector.extract_strided_slice %182 {offsets = [48, 0], sizes = [16, 20], strides = [1, 1]} : vector<64x20xf32> to vector<16x20xf32>
    %194 = tpu.concatenate %193, %193, %193 in 0 : vector<16x20xf32>, vector<16x20xf32>, vector<16x20xf32> -> vector<48x20xf32>
    %195 = arith.addf %192, %194 : vector<48x20xf32>
    %cst_73 = arith.constant 0.000000e+00 : f32
    %196 = vector.broadcast %cst_73 : f32 to vector<48x20xf32>
    %197 = arith.maximumf %195, %196 : vector<48x20xf32>
    %cst_74 = arith.constant dense<0.000000e+00> : vector<48x20xf32>
    %198 = tpu.matmul %189, %5, %cst_74 {dimension_numbers = #tpu.dot_dimension_numbers<[1], [0], [0], [1], [0, 0, 1, 1], [], []>} : vector<48x20xf32>, vector<20x20xf32>, vector<48x20xf32> -> vector<48x20xf32>
    %199 = vector.broadcast %13 : vector<1x20xf32> to vector<48x20xf32>
    %200 = arith.addf %198, %199 : vector<48x20xf32>
    %cst_75 = arith.constant dense<0.000000e+00> : vector<48x20xf32>
    %201 = tpu.matmul %197, %5, %cst_75 {dimension_numbers = #tpu.dot_dimension_numbers<[1], [0], [0], [1], [0, 0, 1, 1], [], []>} : vector<48x20xf32>, vector<20x20xf32>, vector<48x20xf32> -> vector<48x20xf32>
    %202 = vector.broadcast %13 : vector<1x20xf32> to vector<48x20xf32>
    %203 = arith.addf %201, %202 : vector<48x20xf32>
    %204 = vector.shape_cast %200 : vector<48x20xf32> to vector<3x16x20xf32>
    %cst_76 = arith.constant dense<0xFF800000> : vector<3x20xf32>
    %205 = vector.multi_reduction <maximumf>, %204, %cst_76 [1] : vector<3x16x20xf32> to vector<3x20xf32>
    %206 = vector.shape_cast %203 : vector<48x20xf32> to vector<3x16x20xf32>
    %cst_77 = arith.constant dense<0xFF800000> : vector<3x20xf32>
    %207 = vector.multi_reduction <maximumf>, %206, %cst_77 [1] : vector<3x16x20xf32> to vector<3x20xf32>
    %cst_78 = arith.constant dense<0.000000e+00> : vector<3x40xf32>
    %208 = tpu.matmul %205, %6, %cst_78 {dimension_numbers = #tpu.dot_dimension_numbers<[1], [0], [0], [1], [0, 0, 1, 1], [], []>} : vector<3x20xf32>, vector<20x40xf32>, vector<3x40xf32> -> vector<3x40xf32>
    %cst_79 = arith.constant dense<0.000000e+00> : vector<3x40xf32>
    %209 = tpu.matmul %207, %7, %cst_79 {dimension_numbers = #tpu.dot_dimension_numbers<[1], [0], [0], [1], [0, 0, 1, 1], [], []>} : vector<3x20xf32>, vector<20x40xf32>, vector<3x40xf32> -> vector<3x40xf32>
    %210 = arith.addf %208, %209 : vector<3x40xf32>
    %211 = arith.mulf %205, %207 : vector<3x20xf32>
    %cst_80 = arith.constant dense<0.000000e+00> : vector<3x40xf32>
    %212 = tpu.matmul %211, %8, %cst_80 {dimension_numbers = #tpu.dot_dimension_numbers<[1], [0], [0], [1], [0, 0, 1, 1], [], []>} : vector<3x20xf32>, vector<20x40xf32>, vector<3x40xf32> -> vector<3x40xf32>
    %213 = arith.addf %210, %212 : vector<3x40xf32>
    %214 = arith.subf %205, %207 : vector<3x20xf32>
    %215 = math.absf %214 : vector<3x20xf32>
    %cst_81 = arith.constant dense<0.000000e+00> : vector<3x40xf32>
    %216 = tpu.matmul %215, %9, %cst_81 {dimension_numbers = #tpu.dot_dimension_numbers<[1], [0], [0], [1], [0, 0, 1, 1], [], []>} : vector<3x20xf32>, vector<20x40xf32>, vector<3x40xf32> -> vector<3x40xf32>
    %217 = arith.addf %213, %216 : vector<3x40xf32>
    %218 = vector.broadcast %14 : vector<1x40xf32> to vector<3x40xf32>
    %219 = arith.addf %217, %218 : vector<3x40xf32>
    %cst_82 = arith.constant 0.000000e+00 : f32
    %220 = vector.broadcast %cst_82 : f32 to vector<3x40xf32>
    %221 = arith.maximumf %219, %220 : vector<3x40xf32>
    %cst_83 = arith.constant dense<0.000000e+00> : vector<3x1xf32>
    %222 = tpu.matmul %221, %10, %cst_83 {dimension_numbers = #tpu.dot_dimension_numbers<[1], [0], [0], [1], [0, 0, 1, 1], [], []>} : vector<3x40xf32>, vector<40x1xf32>, vector<3x1xf32> -> vector<3x1xf32>
    %223 = vector.broadcast %15 : vector<1x1xf32> to vector<3x1xf32>
    %224 = arith.addf %222, %223 : vector<3x1xf32>
    %cst_84 = arith.constant dense<0.000000e+00> : vector<1xf32>
    %225 = vector.multi_reduction <add>, %224, %cst_84 [0] : vector<3x1xf32> to vector<1xf32>
    %226 = vector.shape_cast %225 : vector<1xf32> to vector<1x1xf32>
    %cst_85 = arith.constant 0.000000e+00 : f32
    %227 = vector.broadcast %cst_85 : f32 to vector<1x1xf32>
    %228 = arith.subf %227, %226 : vector<1x1xf32>
    %229 = math.exp %228 : vector<1x1xf32>
    %cst_86 = arith.constant 1.000000e+00 : f32
    %230 = vector.broadcast %cst_86 : f32 to vector<1x1xf32>
    %231 = arith.addf %230, %229 : vector<1x1xf32>
    %cst_87 = arith.constant 1.000000e+00 : f32
    %232 = vector.broadcast %cst_87 : f32 to vector<1x1xf32>
    %233 = arith.divf %232, %231 : vector<1x1xf32>
    %234 = vector.shape_cast %233 : vector<1x1xf32> to vector<1x1xf32>
    %235 = vector.broadcast %234 : vector<1x1xf32> to vector<8x128xf32>
    %c1_88 = arith.constant 1 : index
    %c0_89 = arith.constant 0 : index
    %c0_90 = arith.constant 0 : index
    %236 = vector.load %arg4[%c1_88, %c0_89, %c0_90] : memref<2x8x128xf32, #tpu.memory_space<vmem>>, vector<1x8x128xf32>
    %237 = vector.shape_cast %236 : vector<1x8x128xf32> to vector<8x128xf32>
    %238 = vector.shape_cast %235 : vector<8x128xf32> to vector<1x8x128xf32>
    tpu.vector_store %arg4[%c1_88, %c0_89, %c0_90], %238 {strides = array<i32>} : memref<2x8x128xf32, #tpu.memory_space<vmem>>, vector<1x8x128xf32>,
    return
  }
  func.func @transform_0(%arg0: i32) -> (i32, i32, i32) {
    %c0_i32 = arith.constant 0 : i32
    %c0_i32_0 = arith.constant 0 : i32
    %c0_i32_1 = arith.constant 0 : i32
    return %arg0, %c0_i32, %c0_i32_0 : i32, i32, i32
  }
  func.func @transform_1(%arg0: i32) -> (i32, i32, i32) {
    %c0_i32 = arith.constant 0 : i32
    %c0_i32_0 = arith.constant 0 : i32
    %c0_i32_1 = arith.constant 0 : i32
    return %arg0, %c0_i32, %c0_i32_0 : i32, i32, i32
  }
  func.func @transform_2(%arg0: i32) -> (i32, i32) {
    %c0_i32 = arith.constant 0 : i32
    %c0_i32_0 = arith.constant 0 : i32
    %c0_i32_1 = arith.constant 0 : i32
    return %c0_i32, %c0_i32_0 : i32, i32
  }
  func.func @transform_3(%arg0: i32) -> (i32, i32, i32) {
    %c0_i32 = arith.constant 0 : i32
    %c0_i32_0 = arith.constant 0 : i32
    %c0_i32_1 = arith.constant 0 : i32
    return %arg0, %c0_i32, %c0_i32_0 : i32, i32, i32
  }
}

</mosaic_0001>

<bundles_post_ra>
// kernel: tpu_custom_call.1
= control target key start
LH: loop header
LB: loop body
LE: loop exit
PB: predicated region body
PF: predicated region fallthrough
CT: control target
= control target key end

     0   :  { %8 = vsyncpa [#allocation3], 0  ;;  %s5085_s0 = inlined_call_operand.vmem [shape: f32[2,64,32], index: 0, kind: input, shape index: {}]   ;;  %s5086_s1 = inlined_call_operand.vmem [shape: f32[2,64,64], index: 1, kind: input, shape index: {}]   ;;  %s5087_s2 = inlined_call_operand.hbm [shape: f32[376,128], index: 2, kind: input, shape index: {}]   ;;  %s5088_s3 = inlined_call_operand.hbm [shape: f32[2,8,128], index: 3, kind: output, shape index: {}]  }
   0x1   :  { %9 = vsyncpa [#allocation4], 0  ;;  %s4409_s12 = smov [#allocation2]   ;;  %s4361_s16 = scalar_lea.hbm %s5087_s2, 6016 }
   0x2   :  { %s19_s13 = sshll.u32 %s4409_s12, 4  ;;  %p4362_p0 = scmp.ne.s32.totalorder %s5087_s2, %s4361_s16  ;;  %s20_s13 = int_to_ptr.vmem [resolvable:$true] %s19_s13 }
   0x3   :  { %p4365_p1 = scmp.lt.u32.totalorder %s4361_s16, %s5087_s2 }
   0x5   :  { %p4367_p2 = pnand %p4365_p1, %p4362_p0 }
   0x7   :  { %4370 = shalt.err (!%p4367_p2)
}
   0x8   :  { %s4371_s21 = scalar_lea.vmem %s20_s13, 6016  ;;  %p4376_p4 = scmp.lt.s32.totalorder %s20_s13, %s20_s13 }
   0x9   :  { %p4372_p3 = scmp.ne.s32.totalorder %s20_s13, %s4371_s21  ;;  %p4377_p5 = scmp.lt.s32.totalorder %s4371_s21, %s4371_s21 }
   0xb   :  { %p4378_p6 = por %p4377_p5, %p4376_p4 }
   0xd   :  { %p4379_p7 = pnand %p4378_p6, %p4372_p3 }
   0xf   :  { %4382 = shalt.err (!%p4379_p7)
}
  0x10   :  { %s4410_s22 = smov 128   ;;  %s4411_s23 = smov 8  }
  0x11   :  { %25 = dma.hbm_to_vmem [thread:$0]  %s5087_s2, 6016, %s20_s13, [#allocation3], %s4410_s22, %s4410_s22, %s4411_s23  }
  0x12   :  { %4405 = dma.done.wait [#allocation3], 6016  }
  0x13   :  { %4406 = vsyncadd [#allocation3], 4294961280  ;;  %v29_v0 = vld [vmem:[#allocation2] sm:$0xff]  ;;  %v30_v1 = vld [vmem:[#allocation2 + $0x8] sm:$0xff]  ;;  %vm97_vm0 = vcmask 261120   ;;  %vm336_vm1 = vcmask 523264  }
  0x14   :  { %v33_v2 = vld [vmem:[#allocation2 + $0x20] sm:$0xff]  ;;  %v4453_v3 = vpack.c.bf16 %v30_v1, %v29_v0  ;;  %v34_v4 = vld [vmem:[#allocation2 + $0x28] sm:$0xff]  ;;  %v31_v5 = vld [vmem:[#allocation2 + $0x10] sm:$0xff]  ;;  %vm808_vm2 = vcmask 1041408   ;;  %vm4412_vm3 = vmmov 1   ;;  %vm619_vm5 = vcmask 80896  }
  0x15   :  { %v32_v6 = vld [vmem:[#allocation2 + $0x18] sm:$0xff]  ;;  %v4455_v7 = vpack.c.bf16 %v34_v4, %v33_v2  ;;  %v35_v9 = vld [vmem:[#allocation2 + $0x30] sm:$0xff]  ;;  %v81_v11 = vld [vmem:[%s5085_s0] sm:$0xff]  ;;  %vm1040_vm6 = vcmask 1043456   ;;  %vm1021_vm7 = vcmask 162816   ;;  %vm4416_vm8 = vmmov 0  }
  0x16   :  { %v4457_v8 = vpack.c.bf16 %v32_v6, %v31_v5  ;;  %v36_v10 = vld [vmem:[#allocation2 + $0x38] sm:$0xff]  ;;  %4094 = vmatprep.subr.bf16.mxu0 %v4453_v3  ;;  %3719 = vmatprep.mubr.msk.f32.mxu0 %vm97_vm0, %v81_v11  ;;  %v82_v13 = vld [vmem:[%s5085_s0 + $0x8] sm:$0xff]  ;;  %v83_v14 = vld [vmem:[%s5085_s0 + $0x10] sm:$0xff]  ;;  %vm1309_vm9 = vcmask 1041409   ;;  %vm1311_vm10 = vcmask 1042434   ;;  %vm1649_vm11 = vcmask 326656  }
  0x17   :  { %v4463_v12 = vpack.c.bf16 %v36_v10, %v35_v9  ;;  %4102 = vmatprep.subr.bf16.mxu1 %v4455_v7  ;;  %4096 = vmatpush3.bf16.msra.mxu0 %v4453_v3  ;;  %v84_v15 = vld [vmem:[%s5085_s0 + $0x18] sm:$0xff]  ;;  %v85_v16 = vld [vmem:[%s5085_s0 + $0x20] sm:$0xff]  ;;  %v86_v17 = vld [vmem:[%s5085_s0 + $0x28] sm:$0xff]  ;;  %vm1723_vm12 = vcmask 2048  }
  0x18   :  { %4104 = vmatpush3.bf16.msra.mxu1 %v4455_v7  ;;  %4098 = vmatprep.subr.bf16.mxu0 %v4457_v8  ;;  %v87_v18 = vld [vmem:[%s5085_s0 + $0x30] sm:$0xff]  ;;  %v88_v19 = vld [vmem:[%s5085_s0 + $0x38] sm:$0xff]  ;;  %v89_v20 = vld [vmem:[%s5086_s1] sm:$0xff] }
  0x19   :  { %4106 = vmatprep.subr.bf16.mxu1 %v4463_v12  ;;  %3739 = vmatprep.mubr.msk.f32.mxu1 %vm97_vm0, %v81_v11  ;;  %v37_v21 = vld [vmem:[#allocation2 + $0x40] sm:$0xff]  ;;  %v90_v46 = vld [vmem:[%s5086_s1 + $0x8] sm:$0xff]  ;;  %v91_v48 = vld [vmem:[%s5086_s1 + $0x10] sm:$0xff] }
  0x1a   :  { %v38_v47 = vld [vmem:[#allocation2 + $0x48] sm:$0xff]  ;;  %v39_v49 = vld [vmem:[#allocation2 + $0x50] sm:$0xff]  ;;  %v92_v50 = vld [vmem:[%s5086_s1 + $0x18] sm:$0xff] }
  0x1b   :  { %4100 = vmatpush3.bf16.msra.mxu0 %v4457_v8  ;;  %v40_v51 = vld [vmem:[#allocation2 + $0x58] sm:$0xff]  ;;  %v93_v52 = vld [vmem:[%s5086_s1 + $0x20] sm:$0xff]  ;;  %v94_v54 = vld [vmem:[%s5086_s1 + $0x28] sm:$0xff] }
  0x1c   :  { %4108 = vmatpush3.bf16.msra.mxu1 %v4463_v12  ;;  %v41_v53 = vld [vmem:[#allocation2 + $0x60] sm:$0xff]  ;;  %v42_v55 = vld [vmem:[#allocation2 + $0x68] sm:$0xff]  ;;  %v95_v56 = vld [vmem:[%s5086_s1 + $0x30] sm:$0xff] }
  0x1d   :  { %v43_v57 = vld [vmem:[#allocation2 + $0x70] sm:$0xff]  ;;  %v96_v58 = vld [vmem:[%s5086_s1 + $0x38] sm:$0xff]  ;;  %v53_v60 = vld [vmem:[#allocation2 + $0xc0] sm:$0xff] }
  0x1e   :  { %3720 = vmatmul.mubr.msk.f32.vlgmr.msra.gmra.mrb[0].mxu0 %vm97_vm0, %v82_v13  ;;  %v44_v59 = vld [vmem:[#allocation2 + $0x78] sm:$0xff]  ;;  %v54_v61 = vld [vmem:[#allocation2 + $0xc8] sm:$0x3]  ;;  %vm4551_vm4 = vmpackc.low %vm808_vm2, %vm4412_vm3 }
  0x1f   :  { %3740 = vmatmul.mubr.msk.f32.vlgmr.msra.gmra.mrb[0].mxu1 %vm97_vm0, %v82_v13  ;;  %3722 = vmatprep.mubr.msk.f32.mxu0 %vm97_vm0, %v83_v14  ;;  %v4549_v62 = vpack.c.bf16 %v54_v61, %v53_v60  ;;  %v3365_v0 = vld [vmem:[#allocation2 + $0x170] ss:$0 sm:$0xff]  ;;  %v4561_v1 = vld [vmem:[#allocation2 + $0x88] sm:$0xff]  ;;  %v45_v4 = vld [vmem:[#allocation2 + $0x80] sm:$0xff] }
  0x20   :  { %3742 = vmatprep.mubr.msk.f32.mxu1 %vm97_vm0, %v83_v14  ;;  %v3433_v63 = vld [vmem:[%s5086_s1 + $0x70] sm:$0xff] }
  0x22   :  { %3723 = vmatmul.mubr.msk.f32.gmra.mrb[2].mxu0 %vm97_vm0, %v84_v15 }
  0x23   :  { %3743 = vmatmul.mubr.msk.f32.gmra.mrb[2].mxu1 %vm97_vm0, %v84_v15  ;;  %3725 = vmatprep.mubr.msk.f32.mxu0 %vm97_vm0, %v85_v16 }
  0x24   :  { %3745 = vmatprep.mubr.msk.f32.mxu1 %vm97_vm0, %v85_v16  ;;  %v48_v16 = vld [vmem:[#allocation2 + $0x98] sm:$0xff] }
  0x26   :  { %3726 = vmatmul.mubr.msk.f32.gmra.mrb[4].mxu0 %vm97_vm0, %v86_v17 }
  0x27   :  { %3746 = vmatmul.mubr.msk.f32.gmra.mrb[4].mxu1 %vm97_vm0, %v86_v17  ;;  %3728 = vmatprep.mubr.msk.f32.mxu0 %vm97_vm0, %v87_v18 }
  0x28   :  { %3748 = vmatprep.mubr.msk.f32.mxu1 %vm97_vm0, %v87_v18 }
  0x2a   :  { %3729 = vmatmul.mubr.msk.f32.gmra.mrb[6].mxu0 %vm97_vm0, %v88_v19 }
  0x2b   :  { %3749 = vmatmul.mubr.msk.f32.gmra.mrb[6].mxu1 %vm97_vm0, %v88_v19  ;;  %3767 = vmatprep.mubr.msk.f32.mxu0 %vm336_vm1, %v89_v20  ;;  %v47_v19 = vld [vmem:[#allocation2 + $0x90] sm:$0xff] }
  0x2c   :  { %3795 = vmatprep.mubr.msk.f32.mxu1 %vm336_vm1, %v37_v21 }
  0xf1   :  { %v3721_v22 = vpop.f32.mrb[0].mxu0 }
  0xf2   :  { %v3741_v23 = vpop.f32.mrb[0].mxu1  ;;  %v188_v24 = vpop.f32.mrb[1].mxu0 }
  0xf3   :  { %v4109_v25 = vpack.c.bf16 %v3721_v22, %v188_v24  ;;  %v293_v26 = vpop.f32.mrb[1].mxu1 }
  0xf4   :  { %v4125_v27 = vpack.c.bf16 %v3741_v23, %v293_v26 }
  0xf5   :  { %v3724_v28 = vpop.f32.mrb[2].mxu0  ;;  %4110 = vmatprep.subr.bf16.mxu0 %v4109_v25 }
  0xf6   :  { %v3744_v29 = vpop.f32.mrb[2].mxu1  ;;  %4126 = vmatprep.subr.bf16.mxu1 %v4125_v27  ;;  %v198_v30 = vpop.f32.mrb[3].mxu0  ;;  %4112 = vmatpush3.bf16.msra.mxu0 %v4109_v25 }
  0xf7   :  { %v4113_v31 = vpack.c.bf16 %v3724_v28, %v198_v30  ;;  %v303_v32 = vpop.f32.mrb[3].mxu1  ;;  %4128 = vmatpush3.bf16.msra.mxu1 %v4125_v27  ;;  %v50_v30 = vld [vmem:[#allocation2 + $0xa8] sm:$0xff] }
  0xf8   :  { %v4129_v33 = vpack.c.bf16 %v3744_v29, %v303_v32 }
  0xf9   :  { %v3727_v34 = vpop.f32.mrb[4].mxu0  ;;  %4114 = vmatprep.subr.bf16.mxu0 %v4113_v31 }
  0xfa   :  { %v3747_v35 = vpop.f32.mrb[4].mxu1  ;;  %4130 = vmatprep.subr.bf16.mxu1 %v4129_v33  ;;  %v208_v36 = vpop.f32.mrb[5].mxu0  ;;  %4116 = vmatpush3.bf16.msra.mxu0 %v4113_v31 }
  0xfb   :  { %v4117_v37 = vpack.c.bf16 %v3727_v34, %v208_v36  ;;  %v313_v38 = vpop.f32.mrb[5].mxu1  ;;  %4132 = vmatpush3.bf16.msra.mxu1 %v4129_v33  ;;  %v49_v34 = vld [vmem:[#allocation2 + $0xa0] sm:$0xff] }
  0xfc   :  { %v4133_v39 = vpack.c.bf16 %v3747_v35, %v313_v38 }
  0xfd   :  { %v3730_v40 = vpop.f32.mrb[6].mxu0  ;;  %4118 = vmatprep.subr.bf16.mxu0 %v4117_v37 }
  0xfe   :  { %v3750_v41 = vpop.f32.mrb[6].mxu1  ;;  %4134 = vmatprep.subr.bf16.mxu1 %v4133_v39  ;;  %v218_v42 = vpop.f32.mrb[7].mxu0  ;;  %4120 = vmatpush3.bf16.msra.mxu0 %v4117_v37 }
  0xff   :  { %v4121_v43 = vpack.c.bf16 %v3730_v40, %v218_v42  ;;  %v323_v44 = vpop.f32.mrb[7].mxu1  ;;  %4136 = vmatpush3.bf16.msra.mxu1 %v4133_v39  ;;  %v52_v42 = vld [vmem:[#allocation2 + $0xb8] sm:$0xff] }
 0x100   :  { %v4137_v45 = vpack.c.bf16 %v3750_v41, %v323_v44 }
 0x101   :  { %4122 = vmatprep.subr.bf16.mxu0 %v4121_v43 }
 0x102   :  { %4138 = vmatprep.subr.bf16.mxu1 %v4137_v45  ;;  %4124 = vmatpush3.bf16.msra.mxu0 %v4121_v43 }
 0x103   :  { %4140 = vmatpush3.bf16.msra.mxu1 %v4137_v45  ;;  %4143 = vmatprep.subr.msk.bf16.mxu0 %vm4551_vm4, %v4549_v62 }
 0x105   :  { %3768 = vmatmul.mubr.msk.f32.vlgmr.msra.gmra.mrb[8].mxu0 %vm336_vm1, %v90_v46  ;;  %v51_v46 = vld [vmem:[#allocation2 + $0xb0] sm:$0xff] }
 0x106   :  { %3796 = vmatmul.mubr.msk.f32.vlgmr.msra.gmra.mrb[8].mxu1 %vm336_vm1, %v38_v47  ;;  %3770 = vmatprep.mubr.msk.f32.mxu0 %vm336_vm1, %v91_v48 }
 0x107   :  { %3798 = vmatprep.mubr.msk.f32.mxu1 %vm336_vm1, %v39_v49  ;;  %4146 = vmatpush3.bf16.msk.msra.mxu0 %vm4551_vm4, %v4549_v62 }
 0x109   :  { %3771 = vmatmul.mubr.msk.f32.gmra.mrb[10].mxu0 %vm336_vm1, %v92_v50 }
 0x10a   :  { %3799 = vmatmul.mubr.msk.f32.gmra.mrb[10].mxu1 %vm336_vm1, %v40_v51  ;;  %3773 = vmatprep.mubr.msk.f32.mxu0 %vm336_vm1, %v93_v52 }
 0x10b   :  { %3801 = vmatprep.mubr.msk.f32.mxu1 %vm336_vm1, %v41_v53 }
 0x10d   :  { %3774 = vmatmul.mubr.msk.f32.gmra.mrb[12].mxu0 %vm336_vm1, %v94_v54 }
 0x10e   :  { %3802 = vmatmul.mubr.msk.f32.gmra.mrb[12].mxu1 %vm336_vm1, %v42_v55  ;;  %3776 = vmatprep.mubr.msk.f32.mxu0 %vm336_vm1, %v95_v56 }
 0x10f   :  { %3804 = vmatprep.mubr.msk.f32.mxu1 %vm336_vm1, %v43_v57 }
 0x111   :  { %3777 = vmatmul.mubr.msk.f32.gmra.mrb[14].mxu0 %vm336_vm1, %v96_v58 }
 0x112   :  { %3805 = vmatmul.mubr.msk.f32.gmra.mrb[14].mxu1 %vm336_vm1, %v44_v59 }
 0x1d8   :  { %v3769_v2 = vpop.f32.mrb[8].mxu0 }
 0x1d9   :  { %v433_v5 = vadd.f32 %v3769_v2, %v3365_v0  ;;  %v4563_v6 = vpop.f32.mrb[8].mxu1  ;;  %v427_v9 = vpop.f32.mrb[9].mxu0 }
 0x1da   :  { %v428_v10 = vadd.f32 %v3365_v0, %v427_v9  ;;  %v556_v11 = vpop.f32.mrb[9].mxu1 }
 0x1db   :  { %v596_v13 = vmul.f32 %v433_v5, %v4561_v1  ;;  %v4566_v14 = vmul.f32 %v556_v11, %v45_v4 }
 0x1dc   :  { %v595_v15 = vmul.f32 %v428_v10, %v45_v4  ;;  %v3772_v17 = vpop.f32.mrb[10].mxu0  ;;  %3811 = vmatprep.mubr.msk.f32.mxu0 %vm619_vm5, %v428_v10 }
 0x1dd   :  { %v443_v18 = vadd.f32 %v3772_v17, %v3365_v0  ;;  %v437_v20 = vpop.f32.mrb[11].mxu0  ;;  %3812 = vmatmul.mubr.msk.f32.vlgmr.msra.gmra.mrb[16].mxu0 %vm619_vm5, %v433_v5  ;;  %v3800_v21 = vpop.f32.mrb[10].mxu1  ;;  %v644_v22 = vmul.f32 %v4566_v14, %v4566_v14  ;;  %v612_v28 = vmul.f32 %v596_v13, %v596_v13 }
 0x1de   :  { %v438_v23 = vadd.f32 %v3365_v0, %v437_v20  ;;  %v566_v24 = vpop.f32.mrb[11].mxu1  ;;  %v611_v25 = vmul.f32 %v595_v15, %v595_v15  ;;  %v606_v4 = vmul.f32 %v3800_v21, %v48_v16 }
 0x1df   :  { %v598_v26 = vmul.f32 %v443_v18, %v48_v16  ;;  %v652_v27 = vsel %vm619_vm5, %v644_v22, 0.0  ;;  %v623_v41 = vsel %vm619_vm5, %v612_v28, 0.0  ;;  %v605_v5 = vmul.f32 %v566_v24, %v47_v19 }
 0x1e0   :  { %v597_v29 = vmul.f32 %v438_v23, %v47_v19  ;;  %653 = vadd.xlane.f32.xlu1 %v652_v27  ;;  %v3775_v31 = vpop.f32.mrb[12].mxu0  ;;  %3814 = vmatprep.mubr.msk.f32.mxu0 %vm619_vm5, %v438_v23  ;;  %v620_v32 = vsel %vm619_vm5, %v611_v25, 0.0 }
 0x1e1   :  { %v453_v33 = vadd.f32 %v3775_v31, %v3365_v0  ;;  %v447_v35 = vpop.f32.mrb[13].mxu0  ;;  %3815 = vmatmul.mubr.msk.f32.gmra.mrb[18].mxu0 %vm619_vm5, %v443_v18  ;;  %621 = vadd.xlane.f32.xlu0 %v620_v32  ;;  %v3803_v36 = vpop.f32.mrb[12].mxu1  ;;  %v614_v43 = vmul.f32 %v598_v26, %v598_v26 }
 0x1e2   :  { %v448_v37 = vadd.f32 %v3365_v0, %v447_v35  ;;  %v576_v38 = vpop.f32.mrb[13].mxu1  ;;  %v613_v39 = vmul.f32 %v597_v29, %v597_v29  ;;  %v608_v10 = vmul.f32 %v3803_v36, %v50_v30 }
 0x1e3   :  { %v600_v40 = vmul.f32 %v453_v33, %v50_v30  ;;  %v629_v56 = vsel %vm619_vm5, %v614_v43, 0.0  ;;  %v607_v25 = vmul.f32 %v576_v38, %v49_v34  ;;  %v646_v30 = vmul.f32 %v605_v5, %v605_v5 }
 0x1e4   :  { %v599_v44 = vmul.f32 %v448_v37, %v49_v34  ;;  %624 = vadd.xlane.f32.xlu1 %v623_v41  ;;  %v3778_v45 = vpop.f32.mrb[14].mxu0  ;;  %3817 = vmatprep.mubr.msk.f32.mxu0 %vm619_vm5, %v448_v37  ;;  %v626_v47 = vsel %vm619_vm5, %v613_v39, 0.0  ;;  %v649_v39 = vmul.f32 %v608_v10, %v608_v10 }
 0x1e5   :  { %v463_v48 = vadd.f32 %v3778_v45, %v3365_v0  ;;  %v3806_v49 = vpop.f32.mrb[14].mxu1  ;;  %v457_v50 = vpop.f32.mrb[15].mxu0  ;;  %3818 = vmatmul.mubr.msk.f32.gmra.mrb[20].mxu0 %vm619_vm5, %v453_v33  ;;  %627 = vadd.xlane.f32.xlu0 %v626_v47  ;;  %v616_v57 = vmul.f32 %v600_v40, %v600_v40  ;;  %v658_v32 = vsel %vm619_vm5, %v646_v30, 0.0  ;;  %v647_v33 = vmul.f32 %v606_v4, %v606_v4 }
 0x1e6   :  { %v610_v51 = vmul.f32 %v3806_v49, %v52_v42  ;;  %v458_v52 = vadd.f32 %v3365_v0, %v457_v50  ;;  %v586_v53 = vpop.f32.mrb[15].mxu1  ;;  %v615_v54 = vmul.f32 %v599_v44, %v599_v44  ;;  %v604_v0 = vmul.f32 %v4563_v6, %v4561_v1 }
 0x1e7   :  { %v609_v55 = vmul.f32 %v586_v53, %v51_v46  ;;  %v602_v60 = vmul.f32 %v463_v48, %v52_v42  ;;  %v635_v11 = vsel %vm619_vm5, %v616_v57, 0.0  ;;  %v661_v35 = vsel %vm619_vm5, %v647_v33, 0.0 }
 0x1e8   :  { %630 = vadd.xlane.f32.xlu1 %v629_v56  ;;  %v632_v58 = vsel %vm619_vm5, %v615_v54, 0.0  ;;  %v677_v59 = vmul.f32 %v610_v51, %v596_v13  ;;  %3820 = vmatprep.mubr.msk.f32.mxu0 %vm619_vm5, %v458_v52  ;;  %v601_v61 = vmul.f32 %v458_v52, %v51_v46  ;;  %v651_v17 = vmul.f32 %v610_v51, %v610_v51 }
 0x1e9   :  { %633 = vadd.xlane.f32.xlu0 %v632_v58  ;;  %3821 = vmatmul.mubr.msk.f32.gmra.mrb[22].mxu0 %vm619_vm5, %v463_v48  ;;  %v676_v2 = vmul.f32 %v609_v55, %v595_v15  ;;  %v678_v9 = vmul.f32 %v609_v55, %v597_v29  ;;  %v679_v18 = vmul.f32 %v610_v51, %v598_v26  ;;  %v667_v41 = vsel %vm619_vm5, %v649_v39, 0.0  ;;  %v56_v39 = vld [vmem:[#allocation2 + $0xd8] sm:$0xff] }
 0x1ea   :  { %v685_v13 = vsel %vm619_vm5, %v677_v59, 0.0  ;;  %v650_v20 = vmul.f32 %v609_v55, %v609_v55  ;;  %v681_v22 = vmul.f32 %v610_v51, %v600_v40  ;;  %v680_v23 = vmul.f32 %v609_v55, %v599_v44 }
 0x1eb   :  { %v701_v15 = vmul.f32 %v604_v0, %v602_v60  ;;  %v700_v27 = vmul.f32 %v4566_v14, %v601_v61  ;;  %v703_v1 = vmul.f32 %v606_v4, %v602_v60  ;;  %v702_v6 = vmul.f32 %v605_v5, %v601_v61 }
 0x1ec   :  { %636 = vadd.xlane.f32.xlu1 %v635_v11  ;;  %v705_v16 = vmul.f32 %v608_v10, %v602_v60  ;;  %v673_v19 = vsel %vm619_vm5, %v651_v17, 0.0  ;;  %v645_v21 = vmul.f32 %v604_v0, %v604_v0  ;;  %v704_v24 = vmul.f32 %v607_v25, %v601_v61 }
 0x1ed   :  { %686 = vadd.xlane.f32.xlu0 %v685_v13  ;;  %v670_v26 = vsel %vm619_vm5, %v650_v20, 0.0  ;;  %v618_v28 = vmul.f32 %v602_v60, %v602_v60  ;;  %v682_v31 = vsel %vm619_vm5, %v676_v2, 0.0  ;;  %v617_v34 = vmul.f32 %v601_v61, %v601_v61 }
 0x1ee   :  { %v655_v29 = vsel %vm619_vm5, %v645_v21, 0.0  ;;  %v648_v36 = vmul.f32 %v607_v25, %v607_v25  ;;  %v688_v40 = vsel %vm619_vm5, %v678_v9, 0.0  ;;  %v691_v42 = vsel %vm619_vm5, %v679_v18, 0.0 }
 0x1ef   :  { %v641_v14 = vsel %vm619_vm5, %v618_v28, 0.0  ;;  %v638_v37 = vsel %vm619_vm5, %v617_v34, 0.0  ;;  %v697_v43 = vsel %vm619_vm5, %v681_v22, 0.0  ;;  %v694_v44 = vsel %vm619_vm5, %v680_v23, 0.0 }
 0x1f0   :  { %674 = vadd.xlane.f32.xlu1 %v673_v19  ;;  %v664_v38 = vsel %vm619_vm5, %v648_v36, 0.0  ;;  %v709_v45 = vsel %vm619_vm5, %v701_v15, 0.0  ;;  %v706_v46 = vsel %vm619_vm5, %v700_v27, 0.0  ;;  %v715_v47 = vsel %vm619_vm5, %v703_v1, 0.0 }
 0x1f1   :  { %671 = vadd.xlane.f32.xlu0 %v670_v26  ;;  %v712_v48 = vsel %vm619_vm5, %v702_v6, 0.0  ;;  %v4413_v49 = vmov 0   ;;  %v721_v50 = vsel %vm619_vm5, %v705_v16, 0.0  ;;  %v718_v51 = vsel %vm619_vm5, %v704_v24, 0.0 }
 0x1f2   :  { %4263 = vset.pattern.permute.xlu1 %v4413_v49  ;;  %4262 = vset.pattern.permute.xlu0 %v4413_v49 }
 0x1f4   :  { %656 = vadd.xlane.f32.xlu1 %v655_v29 }
 0x1f5   :  { %683 = vadd.xlane.f32.xlu0 %v682_v31 }
 0x1f8   :  { %659 = vadd.xlane.f32.xlu1 %v658_v32 }
 0x1f9   :  { %642 = vadd.xlane.f32.xlu0 %v641_v14 }
 0x1fc   :  { %662 = vadd.xlane.f32.xlu1 %v661_v35 }
 0x1fd   :  { %639 = vadd.xlane.f32.xlu0 %v638_v37 }
 0x200   :  { %665 = vadd.xlane.f32.xlu1 %v664_v38  ;;  %v55_v38 = vld [vmem:[#allocation2 + $0xd0] sm:$0xff] }
 0x201   :  { %689 = vadd.xlane.f32.xlu0 %v688_v40 }
 0x204   :  { %668 = vadd.xlane.f32.xlu1 %v667_v41 }
 0x205   :  { %692 = vadd.xlane.f32.xlu0 %v691_v42  ;;  %v4614_v42 = vpack.c.bf16 %v56_v39, %v55_v38 }
 0x207   :  { %4148 = vmatprep.subr.bf16.mxu1 %v4614_v42 }
 0x208   :  { %698 = vadd.xlane.f32.xlu1 %v697_v43  ;;  %4150 = vmatpush3.bf16.msra.mxu1 %v4614_v42 }
 0x209   :  { %695 = vadd.xlane.f32.xlu0 %v694_v44 }
 0x20c   :  { %710 = vadd.xlane.f32.xlu1 %v709_v45 }
 0x20d   :  { %707 = vadd.xlane.f32.xlu0 %v706_v46 }
 0x210   :  { %716 = vadd.xlane.f32.xlu1 %v715_v47 }
 0x211   :  { %713 = vadd.xlane.f32.xlu0 %v712_v48 }
 0x214   :  { %722 = vadd.xlane.f32.xlu1 %v721_v50  ;;  %v4618_v50 = vld [vmem:[#allocation2 + $0xe0] sm:$0xf] }
 0x215   :  { %719 = vadd.xlane.f32.xlu0 %v718_v51  ;;  %3827 = vmatprep.subr.msk.mxu1 %vm1040_vm6, %v4618_v50 }
 0x216   :  { %3828 = vmatpush3.msk.msra.mxu1 %vm1040_vm6, %v4618_v50 }
 0x217   :  { %4152 = vmatprep.subr.bf16.mxu1 %v4614_v42 }
 0x26d   :  { %v4609_v52 = vpop.xlane.xlu1 %653 }
 0x26e   :  { %v622_v53 = vpop.xlane.xlu0 %621  ;;  %v750_v41 = vmax.f32 %v4609_v52, 1e-16 }
 0x26f   :  { %v724_v59 = vmax.f32 %v622_v53, 1e-16 }
 0x271   :  { %v625_v54 = vpop.xlane.xlu1 %624  ;;  %4264 = vrsqrt.f32 %v724_v59 }
 0x272   :  { %v628_v55 = vpop.xlane.xlu0 %627  ;;  %v725_v61 = vmax.f32 %v625_v54, 1e-16 }
 0x273   :  { %v726_v22 = vmax.f32 %v628_v55, 1e-16 }
 0x274   :  { %4266 = vrsqrt.f32 %v725_v61 }
 0x275   :  { %v631_v56 = vpop.xlane.xlu1 %630 }
 0x276   :  { %v634_v57 = vpop.xlane.xlu0 %633  ;;  %v727_v10 = vmax.f32 %v631_v56, 1e-16 }
 0x277   :  { %v728_v28 = vmax.f32 %v634_v57, 1e-16 }
 0x279   :  { %v637_v58 = vpop.xlane.xlu1 %636 }
 0x27a   :  { %v687_v60 = vpop.xlane.xlu0 %686  ;;  %v729_v18 = vmax.f32 %v637_v58, 1e-16 }
 0x27b   :  { %v4265_v20 = vpop.eup %4264 }
 0x27d   :  { %v675_v2 = vpop.xlane.xlu1 %674 }
 0x27e   :  { %v737_v0 = vmax.f32 %v675_v2, 1e-16  ;;  %v672_v4 = vpop.xlane.xlu0 %671  ;;  %v4267_v23 = vpop.eup %4266 }
 0x27f   :  { %v736_v5 = vmax.f32 %v672_v4, 1e-16 }
 0x280   :  { %4268 = vrsqrt.f32 %v737_v0 }
 0x281   :  { %4270 = vrsqrt.f32 %v736_v5  ;;  %v657_v9 = vpop.xlane.xlu1 %656 }
 0x282   :  { %v684_v11 = vpop.xlane.xlu0 %683  ;;  %4272 = vrsqrt.f32 %v727_v10  ;;  %v751_v14 = vmax.f32 %v657_v9, 1e-16 }
 0x283   :  { %4274 = vrsqrt.f32 %v729_v18 }
 0x284   :  { %4276 = vrsqrt.f32 %v726_v22 }
 0x285   :  { %v4611_v17 = vpop.xlane.xlu1 %659 }
 0x286   :  { %v643_v13 = vpop.xlane.xlu0 %642  ;;  %v752_v51 = vmax.f32 %v4611_v17, 1e-16 }
 0x287   :  { %v747_v21 = vmax.f32 %v643_v13, 1e-16 }
 0x289   :  { %v663_v25 = vpop.xlane.xlu1 %662 }
 0x28a   :  { %v4269_v15 = vpop.eup %4268  ;;  %v640_v27 = vpop.xlane.xlu0 %639  ;;  %v753_v6 = vmax.f32 %v663_v25, 1e-16 }
 0x28b   :  { %v4271_v1 = vpop.eup %4270  ;;  %v741_v16 = vmul.f32 %v4269_v15, %v4267_v23  ;;  %v746_v34 = vmax.f32 %v640_v27, 1e-16 }
 0x28c   :  { %v740_v19 = vmul.f32 %v4271_v1, %v4265_v20  ;;  %4278 = vrsqrt.f32 %v753_v6  ;;  %v4273_v31 = vpop.eup %4272 }
 0x28d   :  { %v666_v24 = vpop.xlane.xlu1 %665  ;;  %v769_v26 = vmul.f32 %v741_v16, %v687_v60  ;;  %4280 = vrsqrt.f32 %v747_v21  ;;  %v743_v33 = vmul.f32 %v4273_v31, %v4269_v15  ;;  %v4275_v40 = vpop.eup %4274 }
 0x28e   :  { %v768_v29 = vmul.f32 %v740_v19, %v684_v11  ;;  %v690_v30 = vpop.xlane.xlu0 %689  ;;  %4282 = vrsqrt.f32 %v728_v28  ;;  %v745_v43 = vmul.f32 %v4275_v40, %v4269_v15  ;;  %v4277_v45 = vpop.eup %4276  ;;  %v754_v56 = vmax.f32 %v666_v24, 1e-16 }
 0x28f   :  { %924 = vperm.xlu1 %4263, %v769_v26   ;;  %v742_v46 = vmul.f32 %v4277_v45, %v4271_v1 }
 0x290   :  { %919 = vperm.xlu0 %4262, %v768_v29  }
 0x291   :  { %v669_v32 = vpop.xlane.xlu1 %668  ;;  %v770_v54 = vmul.f32 %v742_v46, %v690_v30 }
 0x292   :  { %v755_v35 = vmax.f32 %v669_v32, 1e-16  ;;  %v693_v36 = vpop.xlane.xlu0 %692  ;;  %v3382_v32 = vld [vmem:[#allocation2 + $0x171] ss:$0 sm:$0xff] }
 0x293   :  { %v771_v37 = vmul.f32 %v743_v33, %v693_v36  ;;  %v4626_v33 = vld [vmem:[#allocation2 + $0x175] ss:$0 sm:$0xff] }
 0x294   :  { %4284 = vrsqrt.f32 %v755_v35 }
 0x295   :  { %4286 = vrsqrt.f32 %v751_v14  ;;  %v699_v44 = vpop.xlane.xlu1 %698  ;;  %934 = vperm.xlu1 %4263, %v771_v37  }
 0x296   :  { %4288 = vrsqrt.f32 %v746_v34  ;;  %v773_v47 = vmul.f32 %v745_v43, %v699_v44  ;;  %v4279_v48 = vpop.eup %4278  ;;  %v696_v52 = vpop.xlane.xlu0 %695 }
 0x297   :  { %4290 = vrsqrt.f32 %v750_v41  ;;  %v4281_v53 = vpop.eup %4280 }
 0x298   :  { %v4283_v55 = vpop.eup %4282  ;;  %v765_v57 = vmul.f32 %v4281_v53, %v4279_v48  ;;  %4292 = vrsqrt.f32 %v752_v51 }
 0x299   :  { %v711_v49 = vpop.xlane.xlu1 %710  ;;  %944 = vperm.xlu1 %4263, %v773_v47   ;;  %v744_v58 = vmul.f32 %v4283_v55, %v4271_v1  ;;  %4294 = vrsqrt.f32 %v754_v56 }
 0x29a   :  { %v708_v9 = vpop.xlane.xlu0 %707 }
 0x29b   :  { %v772_v0 = vmul.f32 %v744_v58, %v696_v52 }
 0x29d   :  { %v717_v59 = vpop.xlane.xlu1 %716  ;;  %929 = vperm.xlu1 %4263, %v770_v54  }
 0x29e   :  { %v4285_v60 = vpop.eup %4284  ;;  %v777_v61 = vmul.f32 %v765_v57, %v717_v59  ;;  %v714_v22 = vpop.xlane.xlu0 %713 }
 0x29f   :  { %v4287_v2 = vpop.eup %4286  ;;  %v767_v4 = vmul.f32 %v4285_v60, %v4281_v53 }
 0x2a0   :  { %v4289_v5 = vpop.eup %4288  ;;  %986 = vperm.xlu0 %4262, %v777_v61   ;;  %v763_v10 = vmul.f32 %v4287_v2, %v4281_v53 }
 0x2a1   :  { %v723_v11 = vpop.xlane.xlu1 %722  ;;  %939 = vperm.xlu1 %4263, %v772_v0   ;;  %v4291_v17 = vpop.eup %4290 }
 0x2a2   :  { %v779_v18 = vmul.f32 %v767_v4, %v723_v11  ;;  %v775_v13 = vmul.f32 %v763_v10, %v711_v49  ;;  %v762_v20 = vmul.f32 %v4291_v17, %v4289_v5  ;;  %v4293_v25 = vpop.eup %4292  ;;  %v720_v6 = vpop.xlane.xlu0 %719 }
 0x2a3   :  { %v764_v15 = vmul.f32 %v4293_v25, %v4289_v5  ;;  %v4295_v27 = vpop.eup %4294 }
 0x2a4   :  { %996 = vperm.xlu0 %4262, %v779_v18   ;;  %v774_v23 = vmul.f32 %v762_v20, %v708_v9  ;;  %v766_v16 = vmul.f32 %v4295_v27, %v4289_v5 }
 0x2a5   :  { %976 = vperm.xlu1 %4263, %v775_v13   ;;  %v776_v1 = vmul.f32 %v764_v15, %v714_v22 }
 0x2a6   :  { %v778_v19 = vmul.f32 %v766_v16, %v720_v6 }
 0x2a9   :  { %971 = vperm.xlu1 %4263, %v774_v23  }
 0x2ad   :  { %981 = vperm.xlu1 %4263, %v776_v1  }
 0x2b0   :  { %v3813_v21 = vpop.f32.mrb[16].mxu0 }
 0x2b1   :  { %v878_v24 = vpop.f32.mrb[17].mxu0  ;;  %991 = vperm.xlu1 %4263, %v778_v19   ;;  %v884_v35 = vadd.f32 %v3813_v21, %v3382_v32 }
 0x2b2   :  { %v879_v38 = vadd.f32 %v3382_v32, %v878_v24 }
 0x2b4   :  { %v3816_v26 = vpop.f32.mrb[18].mxu0 }
 0x2b5   :  { %v888_v28 = vpop.f32.mrb[19].mxu0  ;;  %v894_v48 = vadd.f32 %v3816_v26, %v3382_v32 }
 0x2b6   :  { %v889_v51 = vadd.f32 %v3382_v32, %v888_v28 }
 0x2b8   :  { %v3819_v29 = vpop.f32.mrb[20].mxu0 }
 0x2b9   :  { %v898_v30 = vpop.f32.mrb[21].mxu0  ;;  %v904_v56 = vadd.f32 %v3819_v29, %v3382_v32 }
 0x2ba   :  { %v899_v58 = vadd.f32 %v3382_v32, %v898_v30 }
 0x2bc   :  { %v3822_v31 = vpop.f32.mrb[22].mxu0 }
 0x2bd   :  { %v908_v14 = vpop.f32.mrb[23].mxu0  ;;  %v914_v17 = vadd.f32 %v3822_v31, %v3382_v32 }
 0x2be   :  { %v909_v13 = vadd.f32 %v3382_v32, %v908_v14 }
 0x30e   :  { %v925_v34 = vpop.permute.xlu1 %924 }
 0x30f   :  { %v952_v36 = vmul.f32 %v4626_v33, %v925_v34  ;;  %v920_v37 = vpop.permute.xlu0 %919 }
 0x310   :  { %v951_v39 = vmul.f32 %v4626_v33, %v920_v37 }
 0x311   :  { %v958_v40 = vadd.f32 %v952_v36, %v884_v35  ;;  %v58_v35 = vld [vmem:[#allocation2 + $0xe8] sm:$0xff]  ;;  %v59_v36 = vld [vmem:[#allocation2 + $0xf0] sm:$0xff] }
 0x312   :  { %v957_v41 = vadd.f32 %v951_v39, %v879_v38  ;;  %v4657_v37 = vpack.c.bf16 %v59_v36, %v58_v35  ;;  %v4414_v38 = vmov 0.0|0.0   ;;  %v60_v39 = vld [vmem:[#allocation2 + $0xf8] sm:$0xf] }
 0x313   :  { %v964_v45 = vmax.f32 %v958_v40, 0.0  ;;  %4158 = vmatprep.subr.bf16.mxu0 %v4414_v38  ;;  %v61_v40 = vld [vmem:[#allocation2 + $0x100] sm:$0xff] }
 0x314   :  { %v963_v43 = vmax.f32 %v957_v41, 0.0  ;;  %v935_v44 = vpop.permute.xlu1 %934  ;;  %4160 = vmatpush3.bf16.msra.mxu0 %v4657_v37  ;;  %v62_v41 = vld [vmem:[#allocation2 + $0x108] sm:$0xff] }
 0x315   :  { %v954_v47 = vmul.f32 %v4626_v33, %v935_v44  ;;  %v63_v44 = vld [vmem:[#allocation2 + $0x110] sm:$0xf] }
 0x316   :  { %3829 = vmatprep.mubr.msk.f32.mxu1 %vm1021_vm7, %v963_v43  ;;  %v4669_v43 = vpack.c.bf16 %v62_v41, %v61_v40  ;;  %v68_v40 = vld [vmem:[#allocation2 + $0x138] sm:$0xff] }
 0x317   :  { %3830 = vmatmul.mubr.msk.f32.vlgmr.msra.gmra.mrb[16].mxu1 %vm1021_vm7, %v964_v45  ;;  %v960_v53 = vadd.f32 %v954_v47, %v894_v48  ;;  %v4675_v45 = vld [vmem:[#allocation2 + $0x172] ss:$0 sm:$0xff] }
 0x318   :  { %v945_v46 = vpop.permute.xlu1 %944  ;;  %4154 = vmatpush3.bf16.msra.mxu1 %v4614_v42 }
 0x319   :  { %3842 = vmatprep.subr.msk.mxu1 %vm1040_vm6, %v4618_v50  ;;  %v956_v54 = vmul.f32 %v4626_v33, %v945_v46  ;;  %v966_v61 = vmax.f32 %v960_v53, 0.0 }
 0x31b   :  { %v962_v2 = vadd.f32 %v956_v54, %v904_v56 }
 0x31c   :  { %v930_v49 = vpop.permute.xlu1 %929  ;;  %3843 = vmatpush3.msk.msra.mxu1 %vm1040_vm6, %v4618_v50 }
 0x31d   :  { %v953_v52 = vmul.f32 %v4626_v33, %v930_v49  ;;  %v968_v10 = vmax.f32 %v962_v2, 0.0  ;;  %4155 = vmatprep.subr.bf16.mxu1 %v4414_v38 }
 0x31f   :  { %v959_v55 = vadd.f32 %v953_v52, %v889_v51  ;;  %v987_v5 = vpop.permute.xlu0 %986 }
 0x320   :  { %v940_v57 = vpop.permute.xlu1 %939  ;;  %v1002_v22 = vmul.f32 %v4626_v33, %v987_v5 }
 0x321   :  { %v965_v59 = vmax.f32 %v959_v55, 0.0  ;;  %v955_v60 = vmul.f32 %v4626_v33, %v940_v57 }
 0x322   :  { %v1008_v16 = vadd.f32 %v1002_v22, %v914_v17 }
 0x323   :  { %v961_v0 = vadd.f32 %v955_v60, %v899_v58  ;;  %3832 = vmatprep.mubr.msk.f32.mxu1 %vm1021_vm7, %v965_v59  ;;  %v997_v25 = vpop.permute.xlu0 %996 }
 0x324   :  { %v977_v4 = vpop.permute.xlu1 %976  ;;  %3833 = vmatmul.mubr.msk.f32.gmra.mrb[18].mxu1 %vm1021_vm7, %v966_v61  ;;  %v1004_v19 = vmul.f32 %v4626_v33, %v997_v25  ;;  %v1014_v30 = vmax.f32 %v1008_v16, 0.0 }
 0x325   :  { %v967_v9 = vmax.f32 %v961_v0, 0.0  ;;  %v1000_v11 = vmul.f32 %v4626_v33, %v977_v4 }
 0x326   :  { %v1010_v31 = vadd.f32 %v1004_v19, %v914_v17 }
 0x327   :  { %3835 = vmatprep.mubr.msk.f32.mxu1 %vm1021_vm7, %v967_v9  ;;  %v1006_v23 = vadd.f32 %v1000_v11, %v914_v17 }
 0x328   :  { %v972_v18 = vpop.permute.xlu1 %971  ;;  %3836 = vmatmul.mubr.msk.f32.gmra.mrb[20].mxu1 %vm1021_vm7, %v968_v10  ;;  %v1016_v34 = vmax.f32 %v1010_v31, 0.0 }
 0x329   :  { %v999_v20 = vmul.f32 %v4626_v33, %v972_v18  ;;  %v1012_v21 = vmax.f32 %v1006_v23, 0.0 }
 0x32b   :  { %v1005_v15 = vadd.f32 %v999_v20, %v909_v13 }
 0x32c   :  { %v982_v27 = vpop.permute.xlu1 %981 }
 0x32d   :  { %v1011_v1 = vmax.f32 %v1005_v15, 0.0  ;;  %v1001_v6 = vmul.f32 %v4626_v33, %v982_v27 }
 0x32f   :  { %v1007_v24 = vadd.f32 %v1001_v6, %v909_v13  ;;  %3844 = vmatprep.mubr.msk.f32.mxu1 %vm1021_vm7, %v1011_v1 }
 0x330   :  { %v992_v26 = vpop.permute.xlu1 %991  ;;  %3845 = vmatmul.mubr.msk.f32.vlgmr.msra.gmra.mrb[22].mxu1 %vm1021_vm7, %v1012_v21 }
 0x331   :  { %v1013_v28 = vmax.f32 %v1007_v24, 0.0  ;;  %v1003_v29 = vmul.f32 %v4626_v33, %v992_v26  ;;  %v4415_v33 = vmov 0.0   ;;  %4157 = vmatpush3.bf16.msra.mxu1 %v4669_v43 }
 0x332   :  { %3866 = vmatprep.subr.mxu0 %v4415_v33  ;;  %3868 = vmatprep.mubr.msk.f32.mxu0 %vm4416_vm8, %v4415_v33 }
 0x333   :  { %v1009_v14 = vadd.f32 %v1003_v29, %v909_v13  ;;  %3847 = vmatprep.mubr.msk.f32.mxu1 %vm1021_vm7, %v1013_v28  ;;  %3867 = vmatpush3.msk.msra.mxu0 %vm1040_vm6, %v60_v39  ;;  %v67_v39 = vld [vmem:[#allocation2 + $0x130] sm:$0xff] }
 0x334   :  { %3848 = vmatmul.mubr.msk.f32.gmra.mrb[24].mxu1 %vm1021_vm7, %v1014_v30  ;;  %4164 = vmatprep.subr.bf16.mxu0 %v4414_v38 }
 0x335   :  { %v1015_v32 = vmax.f32 %v1009_v14, 0.0  ;;  %3857 = vmatprep.subr.mxu1 %v4415_v33 }
 0x336   :  { %3858 = vmatpush3.msk.msra.mxu1 %vm1040_vm6, %v63_v44 }
 0x337   :  { %3850 = vmatprep.mubr.msk.f32.mxu1 %vm1021_vm7, %v1015_v32  ;;  %4161 = vmatprep.subr.bf16.mxu1 %v4414_v38 }
 0x338   :  { %3851 = vmatmul.mubr.msk.f32.gmra.mrb[26].mxu1 %vm1021_vm7, %v1016_v34 }
 0x339   :  { %3859 = vmatprep.mubr.msk.f32.mxu1 %vm4416_vm8, %v4415_v33 }
 0x3ea   :  { %v3831_v46 = vpop.f32.mrb[16].mxu1 }
 0x3eb   :  { %v1116_v47 = vadd.f32 %v3831_v46, %v4675_v45  ;;  %v1110_v48 = vpop.f32.mrb[17].mxu1 }
 0x3ec   :  { %v1111_v49 = vadd.f32 %v4675_v45, %v1110_v48 }
 0x3ed   :  { %v1253_v51 = vsel %vm1021_vm7, %v1116_v47, -inf }
 0x3ee   :  { %v1252_v52 = vsel %vm1021_vm7, %v1111_v49, -inf }
 0x3ef   :  { %v1254_v53 = vmax.f32 %v1252_v52, %v1253_v51  ;;  %v4698_v52 = vpack.c.bf16 %v68_v40, %v67_v39 }
 0x3f1   :  { %v1255_v54 = vrot.slane %v1254_v53, 4 }
 0x3f3   :  { %v1256_v55 = vmax.f32 %v1254_v53, %v1255_v54 }
 0x3f5   :  { %v1257_v61 = vrot.slane %v1256_v55, 2 }
 0x3f7   :  { %v3834_v56 = vpop.f32.mrb[18].mxu1  ;;  %v1258_v18 = vmax.f32 %v1256_v55, %v1257_v61 }
 0x3f8   :  { %v1126_v57 = vadd.f32 %v3834_v56, %v4675_v45  ;;  %v1120_v58 = vpop.f32.mrb[19].mxu1 }
 0x3f9   :  { %v1121_v59 = vadd.f32 %v4675_v45, %v1120_v58  ;;  %v1259_v15 = vrot.slane %v1258_v18, 1 }
 0x3fa   :  { %v1262_v60 = vsel %vm1021_vm7, %v1126_v57, -inf }
 0x3fb   :  { %v1261_v2 = vsel %vm1021_vm7, %v1121_v59, -inf  ;;  %v3837_v0 = vpop.f32.mrb[20].mxu1  ;;  %v1260_v29 = vmax.f32 %v1258_v18, %v1259_v15 }
 0x3fc   :  { %v1263_v4 = vmax.f32 %v1261_v2, %v1262_v60  ;;  %v1136_v5 = vadd.f32 %v3837_v0, %v4675_v45  ;;  %v1130_v9 = vpop.f32.mrb[21].mxu1 }
 0x3fd   :  { %v1131_v10 = vadd.f32 %v4675_v45, %v1130_v9 }
 0x3fe   :  { %v1264_v11 = vrot.slane %v1263_v4, 4  ;;  %v1271_v17 = vsel %vm1021_vm7, %v1136_v5, -inf }
 0x3ff   :  { %v1270_v13 = vsel %vm1021_vm7, %v1131_v10, -inf }
 0x400   :  { %v1265_v20 = vmax.f32 %v1263_v4, %v1264_v11  ;;  %v1272_v22 = vmax.f32 %v1270_v13, %v1271_v17 }
 0x402   :  { %v1266_v23 = vrot.slane %v1265_v20, 2  ;;  %v1273_v25 = vrot.slane %v1272_v22, 4 }
 0x403   :  { %v3846_v27 = vpop.f32.mrb[22].mxu1 }
 0x404   :  { %v1267_v1 = vmax.f32 %v1265_v20, %v1266_v23  ;;  %v1274_v6 = vmax.f32 %v1272_v22, %v1273_v25  ;;  %v1229_v16 = vadd.f32 %v3846_v27, %v4675_v45  ;;  %v1223_v19 = vpop.f32.mrb[23].mxu1 }
 0x405   :  { %v1224_v21 = vadd.f32 %v4675_v45, %v1223_v19 }
 0x406   :  { %v1268_v24 = vrot.slane %v1267_v1, 1  ;;  %v1275_v26 = vrot.slane %v1274_v6, 2  ;;  %v1280_v28 = vsel %vm1021_vm7, %v1229_v16, -inf  ;;  %v65_v16 = vld [vmem:[#allocation2 + $0x120] sm:$0xff] }
 0x407   :  { %v1279_v30 = vsel %vm1021_vm7, %v1224_v21, -inf  ;;  %v3849_v31 = vpop.f32.mrb[24].mxu1 }
 0x408   :  { %v1269_v14 = vmax.f32 %v1267_v1, %v1268_v24  ;;  %v1276_v32 = vmax.f32 %v1274_v6, %v1275_v26  ;;  %v1281_v34 = vmax.f32 %v1279_v30, %v1280_v28  ;;  %v1239_v35 = vadd.f32 %v3849_v31, %v4675_v45  ;;  %v1233_v36 = vpop.f32.mrb[25].mxu1  ;;  %v64_v6 = vld [vmem:[#allocation2 + $0x118] sm:$0xff] }
 0x409   :  { %v1234_v41 = vadd.f32 %v4675_v45, %v1233_v36  ;;  %v4713_v28 = vpack.c.bf16 %v65_v16, %v64_v6 }
 0x40a   :  { %v1277_v44 = vrot.slane %v1276_v32, 1  ;;  %v1282_v46 = vrot.slane %v1281_v34, 4  ;;  %v1289_v47 = vsel %vm1021_vm7, %v1239_v35, -inf  ;;  %v1391_v48 = vsel %vm1309_vm9, %v1269_v14, %v1260_v29 }
 0x40b   :  { %v1288_v49 = vsel %vm1021_vm7, %v1234_v41, -inf  ;;  %v3852_v51 = vpop.f32.mrb[26].mxu1  ;;  %v4724_v41 = vld [vmem:[#allocation2 + $0x128] sm:$0xf] }
 0x40c   :  { %v1278_v53 = vmax.f32 %v1276_v32, %v1277_v44  ;;  %v1283_v54 = vmax.f32 %v1281_v34, %v1282_v46  ;;  %v1290_v55 = vmax.f32 %v1288_v49, %v1289_v47  ;;  %v1249_v56 = vadd.f32 %v3852_v51, %v4675_v45  ;;  %v1243_v57 = vpop.f32.mrb[27].mxu1  ;;  %v3419_v46 = vld [vmem:[%s5085_s0 + $0x40] sm:$0xff]  ;;  %v3420_v47 = vld [vmem:[%s5085_s0 + $0x48] sm:$0xff]  ;;  %v71_v49 = vld [vmem:[#allocation2 + $0x150] sm:$0xff] }
 0x40d   :  { %v1244_v58 = vadd.f32 %v4675_v45, %v1243_v57  ;;  %v69_v45 = vld [vmem:[#allocation2 + $0x140] sm:$0xf] }
 0x40e   :  { %v1284_v59 = vrot.slane %v1283_v54, 2  ;;  %v1291_v60 = vrot.slane %v1290_v55, 4  ;;  %v1298_v61 = vsel %vm1021_vm7, %v1249_v56, -inf  ;;  %v1392_v2 = vsel %vm1311_vm10, %v1278_v53, %v1391_v48  ;;  %v70_v48 = vld [vmem:[#allocation2 + $0x148] sm:$0xff]  ;;  %v73_v56 = vld [vmem:[#allocation2 + $0x160] sm:$0xff] }
 0x40f   :  { %v1297_v0 = vsel %vm1021_vm7, %v1244_v58, -inf  ;;  %3869 = vmatmul.mubr.msk.f32.vlgmr.msra.gmra.mrb[24].mxu0 %vm1021_vm7, %v1392_v2  ;;  %v4753_v51 = vpack.c.bf16 %v71_v49, %v70_v48  ;;  %v3425_v58 = vld [vmem:[%s5085_s0 + $0x70] sm:$0xff] }
 0x410   :  { %v1285_v4 = vmax.f32 %v1283_v54, %v1284_v59  ;;  %v1292_v5 = vmax.f32 %v1290_v55, %v1291_v60  ;;  %v1299_v9 = vmax.f32 %v1297_v0, %v1298_v61  ;;  %4166 = vmatpush3.bf16.msra.mxu0 %v4698_v52  ;;  %3886 = vmatprep.mubr.msk.f32.mxu0 %vm4416_vm8, %v4415_v33  ;;  %v3424_v54 = vld [vmem:[%s5085_s0 + $0x68] sm:$0xff]  ;;  %v72_v55 = vld [vmem:[#allocation2 + $0x158] sm:$0xff] }
 0x411   :  { %3884 = vmatprep.subr.mxu0 %v4415_v33  ;;  %v4765_v57 = vpack.c.bf16 %v73_v56, %v72_v55  ;;  %v3426_v59 = vld [vmem:[%s5085_s0 + $0x78] sm:$0xff]  ;;  %v74_v60 = vld [vmem:[#allocation2 + $0x168] sm:$0xff] }
 0x412   :  { %v1286_v10 = vrot.slane %v1285_v4, 1  ;;  %v1293_v11 = vrot.slane %v1292_v5, 2  ;;  %v1300_v17 = vrot.slane %v1299_v9, 4  ;;  %v4337_v56 = vld [vmem:[#allocation2 + $0x48] sm:$0xff] }
 0x414   :  { %v1287_v18 = vmax.f32 %v1285_v4, %v1286_v10  ;;  %v1294_v13 = vmax.f32 %v1292_v5, %v1293_v11  ;;  %v1301_v20 = vmax.f32 %v1299_v9, %v1300_v17  ;;  %3885 = vmatpush3.msk.msra.mxu0 %vm1040_vm6, %v69_v45 }
 0x415   :  { %4174 = vmatprep.subr.bf16.mxu0 %v4453_v3 }
 0x416   :  { %v1295_v22 = vrot.slane %v1294_v13, 1  ;;  %v1302_v23 = vrot.slane %v1301_v20, 2  ;;  %v1552_v25 = vsub.f32 %v1260_v29, %v1287_v18  ;;  %v1468_v15 = vmul.f32 %v1287_v18, %v1260_v29 }
 0x418   :  { %v1296_v27 = vmax.f32 %v1294_v13, %v1295_v22  ;;  %v1303_v1 = vmax.f32 %v1301_v20, %v1302_v23  ;;  %v1555_v31 = vand.u32 2147483647, %v1552_v25 }
 0x41a   :  { %v1304_v19 = vrot.slane %v1303_v1, 1  ;;  %v1310_v21 = vsel %vm1309_vm9, %v1296_v27, %v1287_v18  ;;  %v1553_v24 = vsub.f32 %v1269_v14, %v1296_v27  ;;  %v1469_v26 = vmul.f32 %v1296_v27, %v1269_v14  ;;  %v3416_v18 = vld [vmem:[#allocation2 + $0x173] ss:$0 sm:$0xff] }
 0x41c   :  { %v1305_v30 = vmax.f32 %v1303_v1, %v1304_v19  ;;  %v1556_v32 = vand.u32 2147483647, %v1553_v24  ;;  %v1474_v34 = vsel %vm1309_vm9, %v1469_v26, %v1468_v15 }
 0x41e   :  { %v1312_v35 = vsel %vm1311_vm10, %v1305_v30, %v1310_v21  ;;  %v1554_v36 = vsub.f32 %v1278_v53, %v1305_v30  ;;  %v1561_v29 = vsel %vm1309_vm9, %v1556_v32, %v1555_v31  ;;  %v1470_v39 = vmul.f32 %v1305_v30, %v1278_v53  ;;  %v3423_v53 = vld [vmem:[%s5085_s0 + $0x60] sm:$0xff]  ;;  %v3428_v31 = vld [vmem:[%s5086_s1 + $0x48] sm:$0xff]  ;;  %v3429_v32 = vld [vmem:[%s5086_s1 + $0x50] sm:$0xff] }
 0x41f   :  { %3860 = vmatmul.mubr.msk.f32.vlgmr.msra.gmra.mrb[28].mxu1 %vm1021_vm7, %v1312_v35  ;;  %v3427_v30 = vld [vmem:[%s5086_s1 + $0x40] sm:$0xff] }
 0x420   :  { %4163 = vmatpush3.bf16.msra.mxu1 %v4713_v28  ;;  %3877 = vmatprep.mubr.msk.f32.mxu1 %vm4416_vm8, %v4415_v33  ;;  %v1557_v14 = vand.u32 2147483647, %v1554_v36  ;;  %v1475_v40 = vsel %vm1311_vm10, %v1470_v39, %v1474_v34  ;;  %v3430_v34 = vld [vmem:[%s5086_s1 + $0x58] sm:$0xff]  ;;  %v3431_v35 = vld [vmem:[%s5086_s1 + $0x60] sm:$0xff] }
 0x421   :  { %3875 = vmatprep.subr.mxu1 %v4415_v33  ;;  %v3434_v36 = vld [vmem:[%s5086_s1 + $0x78] sm:$0xff] }
 0x422   :  { %v1562_v44 = vsel %vm1311_vm10, %v1557_v14, %v1561_v29 }
 0x423   :  { %3887 = vmatmul.mubr.msk.f32.vlgmr.msra.gmra.mrb[26].mxu0 %vm1021_vm7, %v1562_v44 }
 0x424   :  { %3876 = vmatpush3.msk.msra.mxu1 %vm1040_vm6, %v4724_v41  ;;  %4176 = vmatpush3.bf16.msra.mxu0 %v4453_v3  ;;  %v3421_v3 = vld [vmem:[%s5085_s0 + $0x50] sm:$0xff] }
 0x425   :  { %3878 = vmatmul.mubr.msk.f32.vlgmr.msra.gmra.mrb[30].mxu1 %vm1021_vm7, %v1475_v40  ;;  %4178 = vmatprep.subr.bf16.mxu0 %v4457_v8 }
 0x426   :  { %4167 = vmatprep.subr.bf16.mxu1 %v4414_v38  ;;  %3899 = vmatprep.mubr.msk.f32.mxu1 %vm4416_vm8, %v4415_v33 }
 0x427   :  { %3910 = vmatprep.mubr.msk.f32.mxu0 %vm97_vm0, %v3419_v46  ;;  %4169 = vmatpush3.bf16.msra.mxu1 %v4753_v51 }
 0x428   :  { %4180 = vmatpush3.bf16.msra.mxu0 %v4457_v8  ;;  %v3422_v8 = vld [vmem:[%s5085_s0 + $0x58] sm:$0xff]  ;;  %4170 = vmatprep.subr.bf16.mxu1 %v4414_v38 }
 0x42b   :  { %3911 = vmatmul.mubr.msk.f32.vlgmr.msra.gmra.mrb[28].mxu0 %vm97_vm0, %v3420_v47  ;;  %4172 = vmatpush3.bf16.msra.mxu1 %v4765_v57 }
 0x42c   :  { %3913 = vmatprep.mubr.msk.f32.mxu0 %vm97_vm0, %v3421_v3  ;;  %3897 = vmatprep.subr.mxu1 %v4415_v33 }
 0x42f   :  { %3914 = vmatmul.mubr.msk.f32.gmra.mrb[30].mxu0 %vm97_vm0, %v3422_v8  ;;  %3898 = vmatpush3.msra.mxu1 %v74_v60  ;;  %v4340_v60 = vld [vmem:[#allocation2 + $0x60] sm:$0xff] }
 0x430   :  { %3916 = vmatprep.mubr.msk.f32.mxu0 %vm97_vm0, %v3423_v53  ;;  %4182 = vmatprep.subr.bf16.mxu1 %v4455_v7 }
 0x433   :  { %3917 = vmatmul.mubr.msk.f32.gmra.mrb[32].mxu0 %vm97_vm0, %v3424_v54 }
 0x434   :  { %3919 = vmatprep.mubr.msk.f32.mxu0 %vm97_vm0, %v3425_v58 }
 0x437   :  { %3920 = vmatmul.mubr.msk.f32.gmra.mrb[34].mxu0 %vm97_vm0, %v3426_v59 }
 0x438   :  { %3958 = vmatprep.mubr.msk.f32.mxu0 %vm336_vm1, %v3427_v30 }
 0x4e2   :  { %v1464_v61 = vpop.f32.mrb[24].mxu0 }
 0x4e3   :  { %v3870_v2 = vpop.f32.mrb[25].mxu0 }
 0x4e4   :  { %v4342_v2 = vld [vmem:[#allocation2 + $0x70] sm:$0xff] }
 0x4f2   :  { %v1384_v0 = vpop.f32.mrb[28].mxu1 }
 0x4f3   :  { %v1465_v4 = vadd.f32 %v1464_v61, %v1384_v0  ;;  %v3861_v5 = vpop.f32.mrb[29].mxu1  ;;  %v4341_v61 = vld [vmem:[#allocation2 + $0x68] sm:$0xff]  ;;  %v4343_v0 = vld [vmem:[#allocation2 + $0x78] sm:$0xff] }
 0x4f4   :  { %v4344_v5 = vld [vmem:[#allocation2 + $0x170] ss:$0 sm:$0xff] }
 0x4f6   :  { %v1634_v9 = vpop.f32.mrb[26].mxu0 }
 0x4f7   :  { %v3888_v45 = vpop.f32.mrb[27].mxu0 }
 0x4f8   :  { %v1547_v10 = vpop.f32.mrb[30].mxu1 }
 0x4f9   :  { %v1551_v11 = vadd.f32 %v1547_v10, %v1465_v4  ;;  %v3879_v17 = vpop.f32.mrb[31].mxu1 }
 0x4fb   :  { %v1638_v13 = vadd.f32 %v1634_v9, %v1551_v11  ;;  %v4846_v11 = vld [vmem:[#allocation2 + $0x88] sm:$0xff] }
 0x4fd   :  { %v1643_v20 = vadd.f32 %v3416_v18, %v1638_v13  ;;  %v4851_v18 = vld [vmem:[#allocation2 + $0x80] sm:$0xff] }
 0x4fe   :  { %v3912_v23 = vpop.f32.mrb[28].mxu0 }
 0x4ff   :  { %v1644_v22 = vmax.f32 %v1643_v20, 0.0  ;;  %v1851_v25 = vpop.f32.mrb[29].mxu0 }
 0x501   :  { %3900 = vmatmul.mubr.msk.f32.vlgmr.msra.gmra.mrb[32].mxu1 %vm1649_vm11, %v1644_v22 }
 0x502   :  { %4184 = vmatpush3.bf16.msra.mxu1 %v4455_v7  ;;  %3930 = vmatprep.mubr.msk.f32.mxu1 %vm97_vm0, %v3419_v46  ;;  %v4336_v7 = vld [vmem:[#allocation2 + $0x40] sm:$0xff]  ;;  %v3915_v15 = vpop.f32.mrb[30].mxu0 }
 0x503   :  { %4186 = vmatprep.subr.bf16.mxu1 %v4463_v12  ;;  %v1861_v27 = vpop.f32.mrb[31].mxu0 }
 0x504   :  { %v4193_v1 = vpack.c.bf16 %v3915_v15, %v1861_v27  ;;  %v4347_v27 = vld [vmem:[#allocation2 + $0x98] sm:$0xff] }
 0x506   :  { %4188 = vmatpush3.bf16.msra.mxu1 %v4463_v12  ;;  %v4189_v12 = vpack.c.bf16 %v3912_v23, %v1851_v25  ;;  %v3918_v6 = vpop.f32.mrb[32].mxu0 }
 0x507   :  { %v1871_v16 = vpop.f32.mrb[33].mxu0 }
 0x508   :  { %4190 = vmatprep.subr.bf16.mxu0 %v4189_v12  ;;  %v4197_v19 = vpack.c.bf16 %v3918_v6, %v1871_v16  ;;  %v4348_v6 = vld [vmem:[#allocation2 + $0x90] sm:$0xff] }
 0x509   :  { %3931 = vmatmul.mubr.msk.f32.vlgmr.msra.gmra.mrb[34].mxu1 %vm97_vm0, %v3420_v47  ;;  %4192 = vmatpush3.bf16.msra.mxu0 %v4189_v12 }
 0x50a   :  { %3933 = vmatprep.mubr.msk.f32.mxu1 %vm97_vm0, %v3421_v3  ;;  %4194 = vmatprep.subr.bf16.mxu0 %v4193_v1  ;;  %v3921_v21 = vpop.f32.mrb[34].mxu0 }
 0x50b   :  { %v1881_v24 = vpop.f32.mrb[35].mxu0 }
 0x50c   :  { %v4201_v26 = vpack.c.bf16 %v3921_v21, %v1881_v24 }
 0x50d   :  { %3934 = vmatmul.mubr.msk.f32.gmra.mrb[36].mxu1 %vm97_vm0, %v3422_v8  ;;  %4196 = vmatpush3.bf16.msra.mxu0 %v4193_v1 }
 0x50e   :  { %3936 = vmatprep.mubr.msk.f32.mxu1 %vm97_vm0, %v3423_v53  ;;  %4198 = vmatprep.subr.bf16.mxu0 %v4197_v19 }
 0x511   :  { %3937 = vmatmul.mubr.msk.f32.gmra.mrb[38].mxu1 %vm97_vm0, %v3424_v54  ;;  %4200 = vmatpush3.bf16.msra.mxu0 %v4197_v19 }
 0x512   :  { %3939 = vmatprep.mubr.msk.f32.mxu1 %vm97_vm0, %v3425_v58  ;;  %4202 = vmatprep.subr.bf16.mxu0 %v4201_v26  ;;  %v4338_v58 = vld [vmem:[#allocation2 + $0x50] sm:$0xff] }
 0x515   :  { %3940 = vmatmul.mubr.msk.f32.gmra.mrb[40].mxu1 %vm97_vm0, %v3426_v59  ;;  %4204 = vmatpush3.bf16.msra.mxu0 %v4201_v26  ;;  %v4339_v59 = vld [vmem:[#allocation2 + $0x58] sm:$0xff] }
 0x516   :  { %3986 = vmatprep.mubr.msk.f32.mxu1 %vm336_vm1, %v4336_v7  ;;  %4223 = vmatprep.subr.msk.bf16.mxu0 %vm4551_vm4, %v4549_v62 }
 0x518   :  { %3959 = vmatmul.mubr.msk.f32.vlgmr.msra.gmra.mrb[36].mxu0 %vm336_vm1, %v3428_v31 }
 0x519   :  { %4226 = vmatpush3.bf16.msk.msra.mxu0 %vm4551_vm4, %v4549_v62  ;;  %3961 = vmatprep.mubr.msk.f32.mxu0 %vm336_vm1, %v3429_v32  ;;  %v3432_v62 = vld [vmem:[%s5086_s1 + $0x68] sm:$0xff]  ;;  %s4417_s1 = smov [#allocation5]  }
 0x51a   :  { %4232 = vmatprep.subr.bf16.mxu0 %v4614_v42  ;;  %v4349_v32 = vld [vmem:[#allocation2 + $0xa8] sm:$0xff]  ;;  %s3337_s9 = sshll.u32 %s4417_s1, 4  ;;  %s3338_s9 = int_to_ptr.vmem [resolvable:$true] %s3337_s9 }
 0x51b   :  { %s4383_s10 = scalar_lea.vmem %s3338_s9, 256  ;;  %p4388_p9 = scmp.lt.s32.totalorder %s3338_s9, %s3338_s9 }
 0x51c   :  { %3962 = vmatmul.mubr.msk.f32.gmra.mrb[38].mxu0 %vm336_vm1, %v3430_v34  ;;  %p4384_p8 = scmp.ne.s32.totalorder %s3338_s9, %s4383_s10  ;;  %p4389_p10 = scmp.lt.s32.totalorder %s4383_s10, %s4383_s10 }
 0x51d   :  { %3964 = vmatprep.mubr.msk.f32.mxu0 %vm336_vm1, %v3431_v35 }
 0x51e   :  { %p4390_p11 = por %p4389_p10, %p4388_p9 }
 0x520   :  { %3965 = vmatmul.mubr.msk.f32.gmra.mrb[40].mxu0 %vm336_vm1, %v3432_v62  ;;  %v4350_v62 = vld [vmem:[#allocation2 + $0xa0] sm:$0xff]  ;;  %p4391_p12 = pnand %p4390_p11, %p4384_p8 }
 0x521   :  { %3967 = vmatprep.mubr.msk.f32.mxu0 %vm336_vm1, %v3433_v63 }
 0x524   :  { %3968 = vmatmul.mubr.msk.f32.gmra.mrb[42].mxu0 %vm336_vm1, %v3434_v36 }
 0x5d4   :  { %v4830_v29 = vpop.f32.mrb[32].mxu1 }
 0x5d5   :  { %v3901_v39 = vpop.f32.mrb[33].mxu1 }
 0x5dc   :  { %v3932_v14 = vpop.f32.mrb[34].mxu1 }
 0x5dd   :  { %v1956_v40 = vpop.f32.mrb[35].mxu1 }
 0x5de   :  { %v4205_v44 = vpack.c.bf16 %v3932_v14, %v1956_v40 }
 0x5e0   :  { %v3935_v46 = vpop.f32.mrb[36].mxu1  ;;  %4206 = vmatprep.subr.bf16.mxu1 %v4205_v44 }
 0x5e1   :  { %v1966_v47 = vpop.f32.mrb[37].mxu1  ;;  %4208 = vmatpush3.bf16.msra.mxu1 %v4205_v44 }
 0x5e2   :  { %v4209_v3 = vpack.c.bf16 %v3935_v46, %v1966_v47 }
 0x5e4   :  { %v3938_v8 = vpop.f32.mrb[38].mxu1  ;;  %4210 = vmatprep.subr.bf16.mxu1 %v4209_v3 }
 0x5e5   :  { %v1976_v48 = vpop.f32.mrb[39].mxu1  ;;  %4212 = vmatpush3.bf16.msra.mxu1 %v4209_v3  ;;  %v4351_v3 = vld [vmem:[#allocation2 + $0xb8] sm:$0xff] }
 0x5e6   :  { %v4213_v49 = vpack.c.bf16 %v3938_v8, %v1976_v48  ;;  %v4352_v48 = vld [vmem:[#allocation2 + $0xb0] sm:$0xff] }
 0x5e8   :  { %v3941_v53 = vpop.f32.mrb[40].mxu1  ;;  %4214 = vmatprep.subr.bf16.mxu1 %v4213_v49 }
 0x5e9   :  { %v1986_v54 = vpop.f32.mrb[41].mxu1  ;;  %4216 = vmatpush3.bf16.msra.mxu1 %v4213_v49 }
 0x5ea   :  { %v4217_v55 = vpack.c.bf16 %v3941_v53, %v1986_v54 }
 0x5eb   :  { %v3960_v4 = vpop.f32.mrb[36].mxu0 }
 0x5ec   :  { %4218 = vmatprep.subr.bf16.mxu1 %v4217_v55  ;;  %v2091_v9 = vadd.f32 %v4344_v5, %v3960_v4  ;;  %v2085_v45 = vpop.f32.mrb[37].mxu0 }
 0x5ed   :  { %4220 = vmatpush3.bf16.msra.mxu1 %v4217_v55  ;;  %v2086_v10 = vadd.f32 %v4344_v5, %v2085_v45 }
 0x5ee   :  { %4228 = vmatprep.subr.bf16.mxu1 %v4614_v42  ;;  %v4849_v17 = vmul.f32 %v4846_v11, %v2091_v9 }
 0x5ef   :  { %v4854_v13 = vmul.f32 %v4851_v18, %v2086_v10  ;;  %4002 = vmatprep.mubr.msk.f32.mxu0 %vm619_vm5, %v2086_v10  ;;  %v3963_v20 = vpop.f32.mrb[38].mxu0 }
 0x5f0   :  { %3987 = vmatmul.mubr.msk.f32.vlgmr.msra.gmra.mrb[42].mxu1 %vm336_vm1, %v4337_v56  ;;  %4003 = vmatmul.mubr.msk.f32.vlgmr.msra.gmra.mrb[44].mxu0 %vm619_vm5, %v2091_v9  ;;  %v2246_v22 = vmul.f32 %v4849_v17, %v4849_v17  ;;  %v2101_v7 = vadd.f32 %v4344_v5, %v3963_v20  ;;  %v2095_v23 = vpop.f32.mrb[39].mxu0 }
 0x5f1   :  { %3989 = vmatprep.mubr.msk.f32.mxu1 %vm336_vm1, %v4338_v58  ;;  %4230 = vmatpush3.bf16.msra.mxu1 %v4614_v42  ;;  %v2245_v25 = vmul.f32 %v4854_v13, %v4854_v13  ;;  %v2096_v12 = vadd.f32 %v4344_v5, %v2095_v23 }
 0x5f2   :  { %4018 = vmatprep.subr.msk.mxu1 %vm1040_vm6, %v4618_v50  ;;  %4234 = vmatpush3.bf16.msra.mxu0 %v4614_v42  ;;  %v2256_v15 = vsel %vm619_vm5, %v2246_v22, 0.0  ;;  %v4866_v1 = vmul.f32 %v4347_v27, %v2101_v7 }
 0x5f3   :  { %4033 = vmatprep.subr.msk.mxu0 %vm1040_vm6, %v4618_v50  ;;  %2257 = vadd.xlane.f32.xlu0 %v2256_v15  ;;  %v4868_v16 = vmul.f32 %v4348_v6, %v2096_v12  ;;  %v3966_v19 = vpop.f32.mrb[40].mxu0  ;;  %v2253_v21 = vsel %vm619_vm5, %v2245_v25, 0.0 }
 0x5f4   :  { %3990 = vmatmul.mubr.msk.f32.gmra.mrb[44].mxu1 %vm336_vm1, %v4339_v59  ;;  %4005 = vmatprep.mubr.msk.f32.mxu0 %vm619_vm5, %v2096_v12  ;;  %v2111_v24 = vadd.f32 %v4344_v5, %v3966_v19  ;;  %v2105_v42 = vpop.f32.mrb[41].mxu0  ;;  %v2248_v26 = vmul.f32 %v4866_v1, %v4866_v1 }
 0x5f5   :  { %3992 = vmatprep.mubr.msk.f32.mxu1 %vm336_vm1, %v4340_v60  ;;  %4019 = vmatpush3.msk.msra.mxu1 %vm1040_vm6, %v4618_v50  ;;  %v2106_v30 = vadd.f32 %v4344_v5, %v2105_v42  ;;  %v2247_v31 = vmul.f32 %v4868_v16, %v4868_v16 }
 0x5f6   :  { %4235 = vmatprep.subr.bf16.mxu1 %v4414_v38  ;;  %4006 = vmatmul.mubr.msk.f32.gmra.mrb[46].mxu0 %vm619_vm5, %v2101_v7  ;;  %v4879_v34 = vmul.f32 %v4349_v32, %v2111_v24  ;;  %v2262_v35 = vsel %vm619_vm5, %v2248_v26, 0.0 }
 0x5f7   :  { %4034 = vmatpush3.msk.msra.mxu0 %vm1040_vm6, %v4618_v50  ;;  %2254 = vadd.xlane.f32.xlu0 %v2253_v21  ;;  %v4883_v63 = vmul.f32 %v4350_v62, %v2106_v30  ;;  %v3969_v36 = vpop.f32.mrb[42].mxu0  ;;  %v2259_v39 = vsel %vm619_vm5, %v2247_v31, 0.0 }
 0x5f8   :  { %3993 = vmatmul.mubr.msk.f32.gmra.mrb[46].mxu1 %vm336_vm1, %v4341_v61  ;;  %4241 = vmatprep.subr.bf16.mxu0 %v4414_v38  ;;  %v2121_v14 = vadd.f32 %v4344_v5, %v3969_v36  ;;  %v2115_v40 = vpop.f32.mrb[43].mxu0  ;;  %v2250_v50 = vmul.f32 %v4879_v34, %v4879_v34 }
 0x5f9   :  { %3995 = vmatprep.mubr.msk.f32.mxu1 %vm336_vm1, %v4342_v2  ;;  %4008 = vmatprep.mubr.msk.f32.mxu0 %vm619_vm5, %v2106_v30  ;;  %v2116_v44 = vadd.f32 %v4344_v5, %v2115_v40  ;;  %v2249_v46 = vmul.f32 %v4883_v63, %v4883_v63 }
 0x5fa   :  { %2263 = vadd.xlane.f32.xlu1 %v2262_v35  ;;  %4009 = vmatmul.mubr.msk.f32.gmra.mrb[48].mxu0 %vm619_vm5, %v2111_v24  ;;  %v2268_v47 = vsel %vm619_vm5, %v2250_v50, 0.0  ;;  %v4893_v8 = vmul.f32 %v4351_v3, %v2121_v14 }
 0x5fb   :  { %2260 = vadd.xlane.f32.xlu0 %v2259_v39  ;;  %v2235_v49 = vmul.f32 %v4352_v48, %v2116_v44  ;;  %4011 = vmatprep.mubr.msk.f32.mxu0 %vm619_vm5, %v2116_v44  ;;  %v2265_v53 = vsel %vm619_vm5, %v2249_v46, 0.0 }
 0x5fc   :  { %3996 = vmatmul.mubr.msk.f32.gmra.mrb[48].mxu1 %vm336_vm1, %v4343_v0  ;;  %v2252_v55 = vmul.f32 %v4893_v8, %v4893_v8 }
 0x5fd   :  { %v2251_v54 = vmul.f32 %v2235_v49, %v2235_v49 }
 0x5fe   :  { %2269 = vadd.xlane.f32.xlu1 %v2268_v47  ;;  %4012 = vmatmul.mubr.msk.f32.gmra.mrb[50].mxu0 %vm619_vm5, %v2121_v14  ;;  %v2274_v58 = vsel %vm619_vm5, %v2252_v55, 0.0 }
 0x5ff   :  { %2266 = vadd.xlane.f32.xlu0 %v2265_v53  ;;  %v2271_v56 = vsel %vm619_vm5, %v2251_v54, 0.0 }
 0x602   :  { %2272 = vadd.xlane.f32.xlu1 %v2271_v56 }
 0x603   :  { %2275 = vadd.xlane.f32.xlu0 %v2274_v58 }
 0x6c3   :  { %v3988_v59 = vpop.f32.mrb[42].mxu1 }
 0x6c4   :  { %v2238_v60 = vmul.f32 %v4846_v11, %v3988_v59  ;;  %v2190_v61 = vpop.f32.mrb[43].mxu1 }
 0x6c5   :  { %v2237_v2 = vmul.f32 %v4851_v18, %v2190_v61 }
 0x6c6   :  { %v2278_v0 = vmul.f32 %v2238_v60, %v2238_v60  ;;  %v2334_v50 = vmul.f32 %v2238_v60, %v4893_v8 }
 0x6c7   :  { %v3991_v4 = vpop.f32.mrb[44].mxu1  ;;  %v2277_v5 = vmul.f32 %v2237_v2, %v2237_v2 }
 0x6c8   :  { %v2240_v9 = vmul.f32 %v4347_v27, %v3991_v4  ;;  %v2200_v45 = vpop.f32.mrb[45].mxu1  ;;  %v2288_v10 = vsel %vm619_vm5, %v2278_v0, 0.0  ;;  %v2342_v47 = vsel %vm619_vm5, %v2334_v50, 0.0  ;;  %v4933_v4 = vpop.f32.mrb[44].mxu0 }
 0x6c9   :  { %v2239_v20 = vmul.f32 %v4348_v6, %v2200_v45  ;;  %2289 = vadd.xlane.f32.xlu1 %v2288_v10  ;;  %v2285_v22 = vsel %vm619_vm5, %v2277_v5, 0.0 }
 0x6ca   :  { %2286 = vadd.xlane.f32.xlu0 %v2285_v22  ;;  %v2280_v7 = vmul.f32 %v2240_v9, %v2240_v9  ;;  %v4951_v22 = vld [vmem:[#allocation2 + $0x174] ss:$0 sm:$0xff] }
 0x6cb   :  { %v3994_v23 = vpop.f32.mrb[46].mxu1  ;;  %v2279_v25 = vmul.f32 %v2239_v20, %v2239_v20  ;;  %v2335_v14 = vmul.f32 %v2239_v20, %v2235_v49 }
 0x6cc   :  { %v2242_v12 = vmul.f32 %v4349_v32, %v3994_v23  ;;  %v2210_v11 = vpop.f32.mrb[47].mxu1  ;;  %v2294_v15 = vsel %vm619_vm5, %v2280_v7, 0.0  ;;  %v2333_v32 = vmul.f32 %v2237_v2, %v2235_v49  ;;  %v1720_v7 = vadd.f32 %v4951_v22, %v4830_v29 }
 0x6cd   :  { %v2241_v18 = vmul.f32 %v4350_v62, %v2210_v11  ;;  %2295 = vadd.xlane.f32.xlu1 %v2294_v15  ;;  %v2291_v19 = vsel %vm619_vm5, %v2279_v25, 0.0  ;;  %v2345_v44 = vsel %vm619_vm5, %v2335_v14, 0.0 }
 0x6ce   :  { %2292 = vadd.xlane.f32.xlu0 %v2291_v19  ;;  %v2282_v27 = vmul.f32 %v2242_v12, %v2242_v12  ;;  %v2339_v39 = vsel %vm619_vm5, %v2333_v32, 0.0  ;;  %v2338_v59 = vmul.f32 %v2242_v12, %v4893_v8  ;;  %v1724_v25 = vsel %vm1723_vm12, %v1720_v7, 0.0  ;;  %v4956_v12 = vpop.xlane.xlu1 %2263 }
 0x6cf   :  { %v3997_v21 = vpop.f32.mrb[48].mxu1  ;;  %v2281_v24 = vmul.f32 %v2241_v18, %v2241_v18  ;;  %v2337_v46 = vmul.f32 %v2241_v18, %v2235_v49  ;;  %v1725_v11 = vrot.slane %v1724_v25, 4 }
 0x6d0   :  { %v2244_v6 = vmul.f32 %v4351_v3, %v3997_v21  ;;  %v2220_v42 = vpop.f32.mrb[49].mxu1  ;;  %v2300_v26 = vsel %vm619_vm5, %v2282_v27, 0.0  ;;  %v2336_v3 = vmul.f32 %v2240_v9, %v4893_v8  ;;  %v2354_v61 = vsel %vm619_vm5, %v2338_v59, 0.0 }
 0x6d1   :  { %v2243_v30 = vmul.f32 %v4352_v48, %v2220_v42  ;;  %2301 = vadd.xlane.f32.xlu1 %v2300_v26  ;;  %v2297_v31 = vsel %vm619_vm5, %v2281_v24, 0.0  ;;  %v2351_v48 = vsel %vm619_vm5, %v2337_v46, 0.0  ;;  %v1726_v18 = vadd.f32 %v1725_v11, %v1724_v25 }
 0x6d2   :  { %2298 = vadd.xlane.f32.xlu0 %v2297_v31  ;;  %v2284_v35 = vmul.f32 %v2244_v6, %v2244_v6  ;;  %v2348_v54 = vsel %vm619_vm5, %v2336_v3, 0.0  ;;  %v2310_v55 = vmul.f32 %v2244_v6, %v4849_v17  ;;  %v2312_v17 = vmul.f32 %v2244_v6, %v4866_v1  ;;  %v4960_v19 = vpop.xlane.xlu1 %2269 }
 0x6d3   :  { %v2283_v36 = vmul.f32 %v2243_v30, %v2243_v30  ;;  %v2309_v53 = vmul.f32 %v2243_v30, %v4854_v13  ;;  %v2311_v49 = vmul.f32 %v2243_v30, %v4868_v16  ;;  %v2313_v13 = vmul.f32 %v2243_v30, %v4883_v63  ;;  %v4935_v63 = vpop.f32.mrb[45].mxu0 }
 0x6d4   :  { %v2306_v62 = vsel %vm619_vm5, %v2284_v35, 0.0  ;;  %v2318_v58 = vsel %vm619_vm5, %v2310_v55, 0.0  ;;  %v2324_v16 = vsel %vm619_vm5, %v2312_v17, 0.0  ;;  %v2314_v0 = vmul.f32 %v2244_v6, %v4879_v34  ;;  %v4937_v5 = vpop.f32.mrb[46].mxu0  ;;  %v4949_v34 = vpop.xlane.xlu0 %2257 }
 0x6d5   :  { %2307 = vadd.xlane.f32.xlu1 %v2306_v62  ;;  %v2303_v40 = vsel %vm619_vm5, %v2283_v36, 0.0  ;;  %v2315_v56 = vsel %vm619_vm5, %v2309_v53, 0.0  ;;  %v2321_v60 = vsel %vm619_vm5, %v2311_v49, 0.0  ;;  %v2327_v2 = vsel %vm619_vm5, %v2313_v13, 0.0  ;;  %v4939_v9 = vpop.f32.mrb[47].mxu0 }
 0x6d6   :  { %2340 = vadd.xlane.f32.xlu0 %v2339_v39  ;;  %v2330_v8 = vsel %vm619_vm5, %v2314_v0, 0.0  ;;  %v4941_v1 = vpop.f32.mrb[48].mxu0  ;;  %v1727_v21 = vrot.slane %v1726_v18, 2  ;;  %v2273_v24 = vpop.xlane.xlu1 %2272 }
 0x6d7   :  { %v4943_v45 = vpop.f32.mrb[49].mxu0  ;;  %v2379_v26 = vmax.f32 %v2273_v24, 1e-16 }
 0x6d8   :  { %v4945_v10 = vpop.f32.mrb[50].mxu0  ;;  %v2255_v23 = vpop.xlane.xlu0 %2254  ;;  %v1728_v6 = vadd.f32 %v1727_v21, %v1726_v18 }
 0x6d9   :  { %2304 = vadd.xlane.f32.xlu1 %v2303_v40  ;;  %v4947_v20 = vpop.f32.mrb[51].mxu0  ;;  %4296 = vrsqrt.f32 %v2379_v26  ;;  %v2357_v55 = vmax.f32 %v2255_v23, 1e-16 }
 0x6da   :  { %2346 = vadd.xlane.f32.xlu0 %v2345_v44  ;;  %v1729_v29 = vrot.slane %v1728_v6, 1 }
 0x6dc   :  { %v4958_v15 = vpop.xlane.xlu0 %2260  ;;  %v1730_v36 = vadd.f32 %v1729_v29, %v1728_v6 }
 0x6dd   :  { %2343 = vadd.xlane.f32.xlu1 %v2342_v47  ;;  %v2359_v25 = vmax.f32 %v4958_v15, 1e-16 }
 0x6de   :  { %2352 = vadd.xlane.f32.xlu0 %v2351_v48  ;;  %v1731_v44 = vsub.f32 0.0, %v1730_v36 }
 0x6e0   :  { %v4962_v27 = vpop.xlane.xlu0 %2266  ;;  %v1732_v48 = vmul.f32 1.442695, %v1731_v44 }
 0x6e1   :  { %2349 = vadd.xlane.f32.xlu1 %v2348_v54  ;;  %v2361_v29 = vmax.f32 %v4962_v27, 1e-16 }
 0x6e2   :  { %2316 = vadd.xlane.f32.xlu0 %v2315_v56 }
 0x6e3   :  { %v4297_v54 = vpop.eup %4296 }
 0x6e4   :  { %v2276_v42 = vpop.xlane.xlu0 %2275 }
 0x6e5   :  { %2319 = vadd.xlane.f32.xlu1 %v2318_v58  ;;  %v2380_v62 = vmax.f32 %v2276_v42, 1e-16 }
 0x6e6   :  { %2322 = vadd.xlane.f32.xlu0 %v2321_v60 }
 0x6e9   :  { %2355 = vadd.xlane.f32.xlu1 %v2354_v61 }
 0x6ea   :  { %2328 = vadd.xlane.f32.xlu0 %v2327_v2  ;;  %v2358_v2 = vmax.f32 %v4949_v34, 1e-16  ;;  %v2360_v34 = vmax.f32 %v4956_v12, 1e-16 }
 0x6ed   :  { %2325 = vadd.xlane.f32.xlu1 %v2324_v16 }
 0x6f1   :  { %2331 = vadd.xlane.f32.xlu1 %v2330_v8 }
 0x756   :  { %v2290_v30 = vpop.xlane.xlu1 %2289 }
 0x757   :  { %v2287_v31 = vpop.xlane.xlu0 %2286  ;;  %v2384_v32 = vmax.f32 %v2290_v30, 1e-16 }
 0x758   :  { %v2383_v35 = vmax.f32 %v2287_v31, 1e-16 }
 0x75a   :  { %4298 = vrsqrt.f32 %v2383_v35  ;;  %v2296_v39 = vpop.xlane.xlu1 %2295 }
 0x75b   :  { %v2293_v14 = vpop.xlane.xlu0 %2292  ;;  %4300 = vrsqrt.f32 %v2384_v32  ;;  %v2386_v40 = vmax.f32 %v2296_v39, 1e-16 }
 0x75c   :  { %v2385_v50 = vmax.f32 %v2293_v14, 1e-16  ;;  %4302 = vrsqrt.f32 %v2380_v62  ;;  %v2362_v14 = vmax.f32 %v4960_v19, 1e-16 }
 0x75e   :  { %4304 = vrsqrt.f32 %v2385_v50  ;;  %v2302_v46 = vpop.xlane.xlu1 %2301 }
 0x75f   :  { %v2299_v47 = vpop.xlane.xlu0 %2298  ;;  %4306 = vrsqrt.f32 %v2386_v40  ;;  %v2388_v58 = vmax.f32 %v2302_v46, 1e-16 }
 0x760   :  { %v2387_v3 = vmax.f32 %v2299_v47, 1e-16 }
 0x762   :  { %4308 = vrsqrt.f32 %v2387_v3  ;;  %v2308_v53 = vpop.xlane.xlu1 %2307 }
 0x763   :  { %v2341_v56 = vpop.xlane.xlu0 %2340  ;;  %4310 = vpow2.f32 %v1732_v48  ;;  %v2370_v13 = vmax.f32 %v2308_v53, 1e-16 }
 0x764   :  { %v4299_v49 = vpop.eup %4298  ;;  %4312 = vrsqrt.f32 %v2357_v55 }
 0x765   :  { %v2395_v59 = vmul.f32 %v4299_v49, %v4297_v54  ;;  %v4301_v60 = vpop.eup %4300  ;;  %4314 = vrsqrt.f32 %v2388_v58 }
 0x766   :  { %v2305_v61 = vpop.xlane.xlu1 %2304  ;;  %v4303_v17 = vpop.eup %4302 }
 0x767   :  { %v2407_v16 = vmul.f32 %v2395_v59, %v2341_v56  ;;  %v2369_v0 = vmax.f32 %v2305_v61, 1e-16  ;;  %v2347_v8 = vpop.xlane.xlu0 %2346  ;;  %v2396_v23 = vmul.f32 %v4303_v17, %v4301_v60 }
 0x768   :  { %v4305_v7 = vpop.eup %4304 }
 0x769   :  { %4316 = vrsqrt.f32 %v2369_v0  ;;  %2592 = vperm.xlu0 %4262, %v2407_v16   ;;  %v4307_v11 = vpop.eup %4306  ;;  %v2397_v21 = vmul.f32 %v4305_v7, %v4297_v54 }
 0x76a   :  { %4318 = vrsqrt.f32 %v2370_v13  ;;  %v2344_v18 = vpop.xlane.xlu1 %2343  ;;  %v2398_v26 = vmul.f32 %v4307_v11, %v4303_v17 }
 0x76b   :  { %4320 = vrsqrt.f32 %v2358_v2  ;;  %v2408_v24 = vmul.f32 %v2396_v23, %v2344_v18  ;;  %v2353_v6 = vpop.xlane.xlu0 %2352  ;;  %v2409_v30 = vmul.f32 %v2397_v21, %v2347_v8 }
 0x76c   :  { %v4309_v42 = vpop.eup %4308  ;;  %4322 = vrsqrt.f32 %v2359_v25 }
 0x76d   :  { %2597 = vperm.xlu1 %4263, %v2408_v24   ;;  %v2399_v31 = vmul.f32 %v4309_v42, %v4297_v54  ;;  %v4311_v35 = vpop.eup %4310  ;;  %4324 = vrsqrt.f32 %v2360_v34  ;;  %v4969_v24 = vld [vmem:[#allocation2 + $0x171] ss:$0 sm:$0xff]  ;;  %v4973_v42 = vld [vmem:[#allocation2 + $0x175] ss:$0 sm:$0xff] }
 0x76e   :  { %v2350_v15 = vpop.xlane.xlu1 %2349  ;;  %v4313_v36 = vpop.eup %4312  ;;  %4326 = vrsqrt.f32 %v2361_v29  ;;  %v1734_v48 = vadd.f32 1.0, %v4311_v35 }
 0x76f   :  { %v2410_v32 = vmul.f32 %v2398_v26, %v2350_v15  ;;  %v2317_v62 = vpop.xlane.xlu0 %2316  ;;  %v4315_v39 = vpop.eup %4314  ;;  %v2411_v50 = vmul.f32 %v2399_v31, %v2353_v6  ;;  %4328 = vrsqrt.f32 %v2362_v14  ;;  %v2534_v6 = vadd.f32 %v4969_v24, %v4947_v20 }
 0x770   :  { %v2400_v47 = vmul.f32 %v4315_v39, %v4303_v17  ;;  %4330 = vrcp.f32 %v1734_v48  ;;  %v2539_v15 = vadd.f32 %v4969_v24, %v4945_v10 }
 0x771   :  { %2602 = vperm.xlu1 %4263, %v2409_v30   ;;  %2607 = vperm.xlu0 %4262, %v2410_v32  }
 0x772   :  { %v2320_v40 = vpop.xlane.xlu1 %2319 }
 0x773   :  { %v4317_v12 = vpop.eup %4316  ;;  %v2323_v54 = vpop.xlane.xlu0 %2322 }
 0x774   :  { %v4319_v44 = vpop.eup %4318  ;;  %v2373_v46 = vmul.f32 %v4317_v12, %v4313_v36 }
 0x775   :  { %v4321_v27 = vpop.eup %4320  ;;  %2612 = vperm.xlu1 %4263, %v2411_v50  }
 0x776   :  { %v4323_v3 = vpop.eup %4322  ;;  %v2401_v53 = vmul.f32 %v2373_v46, %v2317_v62  ;;  %v2356_v55 = vpop.xlane.xlu1 %2355  ;;  %v2374_v56 = vmul.f32 %v4321_v27, %v4319_v44 }
 0x777   :  { %v2375_v49 = vmul.f32 %v4323_v3, %v4317_v12  ;;  %v2412_v58 = vmul.f32 %v2400_v47, %v2356_v55  ;;  %v4325_v59 = vpop.eup %4324  ;;  %v2329_v2 = vpop.xlane.xlu0 %2328  ;;  %v2504_v3 = vadd.f32 %v4969_v24, %v4935_v63  ;;  %v2514_v63 = vadd.f32 %v4969_v24, %v4939_v9 }
 0x778   :  { %v2402_v60 = vmul.f32 %v2374_v56, %v2320_v40  ;;  %v4327_v61 = vpop.eup %4326  ;;  %v2376_v17 = vmul.f32 %v4325_v59, %v4319_v44  ;;  %v2509_v56 = vadd.f32 %v4969_v24, %v4933_v4  ;;  %v2519_v4 = vadd.f32 %v4969_v24, %v4937_v5 }
 0x779   :  { %2544 = vperm.xlu1 %4263, %v2401_v53   ;;  %2617 = vperm.xlu0 %4262, %v2412_v58   ;;  %v2403_v13 = vmul.f32 %v2375_v49, %v2323_v54  ;;  %v2377_v16 = vmul.f32 %v4327_v61, %v4317_v12  ;;  %v4329_v7 = vpop.eup %4328  ;;  %v2524_v9 = vadd.f32 %v4969_v24, %v4943_v45 }
 0x77a   :  { %v2326_v19 = vpop.xlane.xlu1 %2325  ;;  %v2378_v23 = vmul.f32 %v4329_v7, %v4319_v44  ;;  %v4331_v18 = vpop.eup %4330  ;;  %v2529_v45 = vadd.f32 %v4969_v24, %v4941_v1  ;;  %v4356_v1 = vld [vmem:[#allocation2 + $0x172] ss:$0 sm:$0xff] }
 0x77b   :  { %v2405_v0 = vmul.f32 %v2377_v16, %v2329_v2  ;;  %v2404_v8 = vmul.f32 %v2376_v17, %v2326_v19 }
 0x77d   :  { %2554 = vperm.xlu1 %4263, %v2403_v13   ;;  %2549 = vperm.xlu0 %4262, %v2402_v60  }
 0x77e   :  { %v2332_v25 = vpop.xlane.xlu1 %2331 }
 0x77f   :  { %v2406_v11 = vmul.f32 %v2378_v23, %v2332_v25 }
 0x781   :  { %2564 = vperm.xlu1 %4263, %v2405_v0   ;;  %2559 = vperm.xlu0 %4262, %v2404_v8  }
 0x785   :  { %1739 = vperm.xlu1 %4263, %v4331_v18   ;;  %2569 = vperm.xlu0 %4262, %v2406_v11  }
 0x7e8   :  { %v2593_v21 = vpop.permute.xlu0 %2592 }
 0x7e9   :  { %v2620_v34 = vmul.f32 %v4973_v42, %v2593_v21 }
 0x7eb   :  { %v2626_v26 = vadd.f32 %v2620_v34, %v2534_v6 }
 0x7ec   :  { %v2598_v29 = vpop.permute.xlu1 %2597 }
 0x7ed   :  { %v2632_v30 = vmax.f32 %v2626_v26, 0.0  ;;  %v2621_v31 = vmul.f32 %v4973_v42, %v2598_v29  ;;  %v4355_v26 = vld [vmem:[#allocation2 + $0x110] sm:$0xf] }
 0x7ef   :  { %v2627_v32 = vadd.f32 %v2621_v31, %v2539_v15  ;;  %4035 = vmatprep.mubr.msk.f32.mxu0 %vm1021_vm7, %v2632_v30 }
 0x7f0   :  { %v2608_v35 = vpop.permute.xlu0 %2607  ;;  %v2603_v62 = vpop.permute.xlu1 %2602 }
 0x7f1   :  { %v2633_v36 = vmax.f32 %v2627_v32, 0.0  ;;  %v2623_v20 = vmul.f32 %v4973_v42, %v2608_v35  ;;  %v2622_v39 = vmul.f32 %v4973_v42, %v2603_v62 }
 0x7f3   :  { %v2629_v14 = vadd.f32 %v2623_v20, %v2539_v15  ;;  %v2628_v40 = vadd.f32 %v2622_v39, %v2534_v6  ;;  %4036 = vmatmul.mubr.msk.f32.vlgmr.msra.gmra.mrb[52].mxu0 %vm1021_vm7, %v2633_v36 }
 0x7f4   :  { %v2613_v12 = vpop.permute.xlu1 %2612  ;;  %4243 = vmatpush3.bf16.msra.mxu0 %v4713_v28 }
 0x7f5   :  { %v2635_v10 = vmax.f32 %v2629_v14, 0.0  ;;  %v2634_v50 = vmax.f32 %v2628_v40, 0.0  ;;  %v2624_v44 = vmul.f32 %v4973_v42, %v2613_v12  ;;  %4066 = vmatprep.subr.mxu0 %v4415_v33 }
 0x7f7   :  { %v2630_v46 = vadd.f32 %v2624_v44, %v2534_v6  ;;  %4038 = vmatprep.mubr.msk.f32.mxu0 %vm1021_vm7, %v2634_v50 }
 0x7f8   :  { %v2618_v27 = vpop.permute.xlu0 %2617  ;;  %4039 = vmatmul.mubr.msk.f32.gmra.mrb[54].mxu0 %vm1021_vm7, %v2635_v10  ;;  %v2545_v47 = vpop.permute.xlu1 %2544 }
 0x7f9   :  { %v2636_v48 = vmax.f32 %v2630_v46, 0.0  ;;  %v2625_v53 = vmul.f32 %v4973_v42, %v2618_v27  ;;  %v2572_v28 = vmul.f32 %v4973_v42, %v2545_v47  ;;  %4067 = vmatpush3.msk.msra.mxu0 %vm1040_vm6, %v4724_v41 }
 0x7fa   :  { %4247 = vmatprep.subr.bf16.mxu0 %v4414_v38 }
 0x7fb   :  { %v2631_v54 = vadd.f32 %v2625_v53, %v2539_v15  ;;  %v2578_v55 = vadd.f32 %v2572_v28, %v2504_v3  ;;  %4041 = vmatprep.mubr.msk.f32.mxu0 %vm1021_vm7, %v2636_v48 }
 0x7fc   :  { %v2550_v49 = vpop.permute.xlu0 %2549  ;;  %v2555_v58 = vpop.permute.xlu1 %2554 }
 0x7fd   :  { %v2637_v19 = vmax.f32 %v2631_v54, 0.0  ;;  %v2584_v59 = vmax.f32 %v2578_v55, 0.0  ;;  %v2573_v60 = vmul.f32 %v4973_v42, %v2550_v49  ;;  %v2574_v41 = vmul.f32 %v4973_v42, %v2555_v58 }
 0x7ff   :  { %v2579_v13 = vadd.f32 %v2573_v60, %v2509_v56  ;;  %v2580_v61 = vadd.f32 %v2574_v41, %v2514_v63  ;;  %4020 = vmatprep.mubr.msk.f32.mxu1 %vm1021_vm7, %v2584_v59  ;;  %4042 = vmatmul.mubr.msk.f32.gmra.mrb[56].mxu0 %vm1021_vm7, %v2637_v19 }
 0x800   :  { %v2560_v2 = vpop.permute.xlu0 %2559  ;;  %v2565_v16 = vpop.permute.xlu1 %2564  ;;  %4068 = vmatprep.mubr.msk.f32.mxu0 %vm4416_vm8, %v4415_v33 }
 0x801   :  { %v2585_v17 = vmax.f32 %v2579_v13, 0.0  ;;  %v2586_v0 = vmax.f32 %v2580_v61, 0.0  ;;  %v2575_v8 = vmul.f32 %v4973_v42, %v2560_v2  ;;  %v2576_v7 = vmul.f32 %v4973_v42, %v2565_v16 }
 0x803   :  { %v2581_v25 = vadd.f32 %v2575_v8, %v2519_v4  ;;  %v2582_v23 = vadd.f32 %v2576_v7, %v2524_v9  ;;  %4021 = vmatmul.mubr.msk.f32.vlgmr.msra.gmra.mrb[50].mxu1 %vm1021_vm7, %v2585_v17 }
 0x804   :  { %v2570_v11 = vpop.permute.xlu0 %2569  ;;  %4023 = vmatprep.mubr.msk.f32.mxu1 %vm1021_vm7, %v2586_v0  ;;  %v1740_v5 = vpop.permute.xlu1 %1739  ;;  %4237 = vmatpush3.bf16.msra.mxu1 %v4669_v43 }
 0x805   :  { %v2587_v18 = vmax.f32 %v2581_v25, 0.0  ;;  %v2588_v21 = vmax.f32 %v2582_v23, 0.0  ;;  %v2577_v6 = vmul.f32 %v4973_v42, %v2570_v11  ;;  %1742 = vst [vmem:[#allocation5] sm:$0xff] %v1740_v5  ;;  %4048 = vmatprep.subr.mxu1 %v4415_v33 }
 0x807   :  { %v2583_v34 = vadd.f32 %v2577_v6, %v2529_v45  ;;  %4024 = vmatmul.mubr.msk.f32.gmra.mrb[52].mxu1 %vm1021_vm7, %v2587_v18 }
 0x808   :  { %4026 = vmatprep.mubr.msk.f32.mxu1 %vm1021_vm7, %v2588_v21  ;;  %4049 = vmatpush3.msk.msra.mxu1 %vm1040_vm6, %v4355_v26 }
 0x809   :  { %v2589_v29 = vmax.f32 %v2583_v34, 0.0  ;;  %4238 = vmatprep.subr.bf16.mxu1 %v4414_v38 }
 0x80b   :  { %4027 = vmatmul.mubr.msk.f32.gmra.mrb[54].mxu1 %vm1021_vm7, %v2589_v29 }
 0x80c   :  { %4050 = vmatprep.mubr.msk.f32.mxu1 %vm4416_vm8, %v4415_v33 }
 0x8c6   :  { %v4037_v43 = vpop.f32.mrb[52].mxu0 }
 0x8c7   :  { %v2841_v24 = vadd.f32 %v4356_v1, %v4037_v43  ;;  %v2835_v42 = vpop.f32.mrb[53].mxu0 }
 0x8c8   :  { %v2836_v15 = vadd.f32 %v4356_v1, %v2835_v42 }
 0x8c9   :  { %v2892_v30 = vsel %vm1021_vm7, %v2841_v24, -inf }
 0x8ca   :  { %v2891_v31 = vsel %vm1021_vm7, %v2836_v15, -inf }
 0x8cb   :  { %v2893_v32 = vmax.f32 %v2891_v31, %v2892_v30  ;;  %v4040_v35 = vpop.f32.mrb[54].mxu0 }
 0x8cc   :  { %v2851_v62 = vadd.f32 %v4356_v1, %v4040_v35  ;;  %v2845_v36 = vpop.f32.mrb[55].mxu0 }
 0x8cd   :  { %v2894_v20 = vrot.slane %v2893_v32, 4  ;;  %v2846_v39 = vadd.f32 %v4356_v1, %v2845_v36 }
 0x8ce   :  { %v2901_v14 = vsel %vm1021_vm7, %v2851_v62, -inf }
 0x8cf   :  { %v2895_v40 = vmax.f32 %v2893_v32, %v2894_v20  ;;  %v2900_v12 = vsel %vm1021_vm7, %v2846_v39, -inf }
 0x8d0   :  { %v2902_v10 = vmax.f32 %v2900_v12, %v2901_v14 }
 0x8d1   :  { %v2896_v50 = vrot.slane %v2895_v40, 2 }
 0x8d2   :  { %v2903_v44 = vrot.slane %v2902_v10, 4  ;;  %v4043_v46 = vpop.f32.mrb[56].mxu0 }
 0x8d3   :  { %v2861_v27 = vadd.f32 %v4356_v1, %v4043_v46  ;;  %v2855_v47 = vpop.f32.mrb[57].mxu0  ;;  %v2897_v3 = vmax.f32 %v2895_v40, %v2896_v50 }
 0x8d4   :  { %v2904_v48 = vmax.f32 %v2902_v10, %v2903_v44  ;;  %v2856_v53 = vadd.f32 %v4356_v1, %v2855_v47 }
 0x8d5   :  { %v2910_v28 = vsel %vm1021_vm7, %v2861_v27, -inf  ;;  %v2898_v19 = vrot.slane %v2897_v3, 1 }
 0x8d6   :  { %v2905_v54 = vrot.slane %v2904_v48, 2  ;;  %v2909_v55 = vsel %vm1021_vm7, %v2856_v53, -inf  ;;  %v4022_v56 = vpop.f32.mrb[50].mxu1  ;;  %v4357_v53 = vld [vmem:[#allocation2 + $0xf8] sm:$0xf] }
 0x8d7   :  { %v2911_v63 = vmax.f32 %v2909_v55, %v2910_v28  ;;  %v2728_v49 = vadd.f32 %v4356_v1, %v4022_v56  ;;  %v2722_v58 = vpop.f32.mrb[51].mxu1  ;;  %v2899_v8 = vmax.f32 %v2897_v3, %v2898_v19 }
 0x8d8   :  { %v2906_v59 = vmax.f32 %v2904_v48, %v2905_v54  ;;  %v2723_v60 = vadd.f32 %v4356_v1, %v2722_v58 }
 0x8d9   :  { %v2912_v41 = vrot.slane %v2911_v63, 4  ;;  %v2865_v13 = vsel %vm1021_vm7, %v2728_v49, -inf }
 0x8da   :  { %v2907_v61 = vrot.slane %v2906_v59, 1  ;;  %v2864_v4 = vsel %vm1021_vm7, %v2723_v60, -inf  ;;  %v4025_v9 = vpop.f32.mrb[52].mxu1 }
 0x8db   :  { %v2913_v2 = vmax.f32 %v2911_v63, %v2912_v41  ;;  %v2866_v16 = vmax.f32 %v2864_v4, %v2865_v13  ;;  %v2738_v17 = vadd.f32 %v4356_v1, %v4025_v9  ;;  %v2732_v0 = vpop.f32.mrb[53].mxu1  ;;  %v4359_v9 = vld [vmem:[#allocation2 + $0x168] sm:$0xff] }
 0x8dc   :  { %v2908_v7 = vmax.f32 %v2906_v59, %v2907_v61  ;;  %v2733_v25 = vadd.f32 %v4356_v1, %v2732_v0 }
 0x8dd   :  { %v2914_v23 = vrot.slane %v2913_v2, 2  ;;  %v2867_v11 = vrot.slane %v2866_v16, 4  ;;  %v2874_v5 = vsel %vm1021_vm7, %v2738_v17, -inf }
 0x8de   :  { %v2873_v45 = vsel %vm1021_vm7, %v2733_v25, -inf  ;;  %v4028_v18 = vpop.f32.mrb[54].mxu1  ;;  %v2921_v21 = vsel %vm1309_vm9, %v2908_v7, %v2899_v8 }
 0x8df   :  { %v2915_v6 = vmax.f32 %v2913_v2, %v2914_v23  ;;  %v2868_v34 = vmax.f32 %v2866_v16, %v2867_v11  ;;  %v2875_v26 = vmax.f32 %v2873_v45, %v2874_v5  ;;  %v2748_v29 = vadd.f32 %v4356_v1, %v4028_v18  ;;  %v2742_v43 = vpop.f32.mrb[55].mxu1  ;;  %v4360_v5 = vld [vmem:[#allocation2 + $0x173] ss:$0 sm:$0xff] }
 0x8e0   :  { %v2743_v24 = vadd.f32 %v4356_v1, %v2742_v43 }
 0x8e1   :  { %v2916_v42 = vrot.slane %v2915_v6, 1  ;;  %v2869_v15 = vrot.slane %v2868_v34, 2  ;;  %v2876_v30 = vrot.slane %v2875_v26, 4  ;;  %v2883_v31 = vsel %vm1021_vm7, %v2748_v29, -inf }
 0x8e2   :  { %v2882_v32 = vsel %vm1021_vm7, %v2743_v24, -inf }
 0x8e3   :  { %v2917_v35 = vmax.f32 %v2915_v6, %v2916_v42  ;;  %v2870_v62 = vmax.f32 %v2868_v34, %v2869_v15  ;;  %v2877_v36 = vmax.f32 %v2875_v26, %v2876_v30  ;;  %v2884_v20 = vmax.f32 %v2882_v32, %v2883_v31 }
 0x8e5   :  { %v2871_v39 = vrot.slane %v2870_v62, 1  ;;  %v2878_v14 = vrot.slane %v2877_v36, 2  ;;  %v2885_v40 = vrot.slane %v2884_v20, 4  ;;  %v2922_v12 = vsel %vm1311_vm10, %v2917_v35, %v2921_v21 }
 0x8e6   :  { %4051 = vmatmul.mubr.msk.f32.vlgmr.msra.gmra.mrb[56].mxu1 %vm1021_vm7, %v2922_v12 }
 0x8e7   :  { %v2872_v10 = vmax.f32 %v2870_v62, %v2871_v39  ;;  %v2879_v1 = vmax.f32 %v2877_v36, %v2878_v14  ;;  %v2886_v50 = vmax.f32 %v2884_v20, %v2885_v40  ;;  %4240 = vmatpush3.bf16.msra.mxu1 %v4657_v37  ;;  %4059 = vmatprep.mubr.msk.f32.mxu1 %vm4416_vm8, %v4415_v33 }
 0x8e8   :  { %4057 = vmatprep.subr.mxu1 %v4415_v33 }
 0x8e9   :  { %v3072_v44 = vmul.f32 %v2899_v8, %v2872_v10  ;;  %v2880_v46 = vrot.slane %v2879_v1, 1  ;;  %v2887_v27 = vrot.slane %v2886_v50, 2  ;;  %v3153_v47 = vsub.f32 %v2872_v10, %v2899_v8 }
 0x8eb   :  { %v2881_v3 = vmax.f32 %v2879_v1, %v2880_v46  ;;  %v2888_v48 = vmax.f32 %v2886_v50, %v2887_v27  ;;  %4058 = vmatpush3.msk.msra.mxu1 %vm1040_vm6, %v4357_v53  ;;  %v3156_v49 = vand.u32 2147483647, %v3153_v47 }
 0x8ec   :  { %4244 = vmatprep.subr.bf16.mxu1 %v4414_v38 }
 0x8ed   :  { %v3073_v28 = vmul.f32 %v2908_v7, %v2881_v3  ;;  %v2889_v54 = vrot.slane %v2888_v48, 1  ;;  %v2998_v37 = vsel %vm1309_vm9, %v2881_v3, %v2872_v10  ;;  %v3154_v55 = vsub.f32 %v2881_v3, %v2908_v7 }
 0x8ef   :  { %v2890_v56 = vmax.f32 %v2888_v48, %v2889_v54  ;;  %v3078_v63 = vsel %vm1309_vm9, %v3073_v28, %v3072_v44  ;;  %v3157_v58 = vand.u32 2147483647, %v3154_v55 }
 0x8f1   :  { %v2999_v19 = vsel %vm1311_vm10, %v2890_v56, %v2998_v37  ;;  %v3074_v59 = vmul.f32 %v2917_v35, %v2890_v56  ;;  %v3155_v60 = vsub.f32 %v2890_v56, %v2917_v35  ;;  %v3162_v41 = vsel %vm1309_vm9, %v3157_v58, %v3156_v49 }
 0x8f2   :  { %4060 = vmatmul.mubr.msk.f32.vlgmr.msra.gmra.mrb[58].mxu1 %vm1021_vm7, %v2999_v19 }
 0x8f3   :  { %4246 = vmatpush3.bf16.msra.mxu1 %v4698_v52  ;;  %v3079_v13 = vsel %vm1311_vm10, %v3074_v59, %v3078_v63  ;;  %4077 = vmatprep.mubr.msk.f32.mxu1 %vm4416_vm8, %v4415_v33  ;;  %v3158_v61 = vand.u32 2147483647, %v3155_v60  ;;  %v4358_v52 = vld [vmem:[#allocation2 + $0x140] sm:$0xf] }
 0x8f4   :  { %4069 = vmatmul.mubr.msk.f32.vlgmr.msra.gmra.mrb[58].mxu0 %vm1021_vm7, %v3079_v13  ;;  %4075 = vmatprep.subr.mxu1 %v4415_v33 }
 0x8f5   :  { %v3163_v4 = vsel %vm1311_vm10, %v3158_v61, %v3162_v41  ;;  %4249 = vmatpush3.bf16.msra.mxu0 %v4753_v51  ;;  %4090 = vmatprep.mubr.msk.f32.mxu0 %vm4416_vm8, %v4415_v33 }
 0x8f6   :  { %4250 = vmatprep.subr.bf16.mxu0 %v4414_v38 }
 0x8f7   :  { %4076 = vmatpush3.msk.msra.mxu1 %vm1040_vm6, %v4358_v52 }
 0x8f8   :  { %4078 = vmatmul.mubr.msk.f32.vlgmr.msra.gmra.mrb[60].mxu1 %vm1021_vm7, %v3163_v4 }
 0x8f9   :  { %4252 = vmatpush3.bf16.msra.mxu0 %v4765_v57 }
 0x8fa   :  { %4088 = vmatprep.subr.mxu0 %v4415_v33 }
 0x8fd   :  { %4089 = vmatpush3.msra.mxu0 %v4359_v9 }
 0x9b9   :  { %v2991_v2 = vpop.f32.mrb[56].mxu1 }
 0x9ba   :  { %v4052_v16 = vpop.f32.mrb[57].mxu1 }
 0x9c5   :  { %v3068_v17 = vpop.f32.mrb[58].mxu1 }
 0x9c6   :  { %v3069_v51 = vadd.f32 %v3068_v17, %v2991_v2  ;;  %v4061_v0 = vpop.f32.mrb[59].mxu1 }
 0x9c7   :  { %v3148_v8 = vpop.f32.mrb[58].mxu0 }
 0x9c8   :  { %v3152_v7 = vadd.f32 %v3148_v8, %v3069_v51  ;;  %v4070_v25 = vpop.f32.mrb[59].mxu0 }
 0x9cb   :  { %v3232_v38 = vpop.f32.mrb[60].mxu1 }
 0x9cc   :  { %v3236_v23 = vadd.f32 %v3232_v38, %v3152_v7  ;;  %v4079_v11 = vpop.f32.mrb[61].mxu1 }
 0x9ce   :  { %v3237_v45 = vadd.f32 %v4360_v5, %v3236_v23 }
 0x9d0   :  { %v3238_v18 = vmax.f32 %v3237_v45, 0.0 }
 0x9d2   :  { %4091 = vmatmul.mubr.msk.f32.vlgmr.msra.gmra.mrb[60].mxu0 %vm1649_vm11, %v3238_v18 }
 0xaa5   :  { %v3308_v57 = vpop.f32.mrb[60].mxu0 }
 0xaa6   :  { %v3309_v33 = vadd.f32 %v4951_v22, %v3308_v57  ;;  %v4092_v21 = vpop.f32.mrb[61].mxu0 }
 0xaa8   :  { %v3312_v6 = vsel %vm1723_vm12, %v3309_v33, 0.0 }
 0xaa9   :  { %v3313_v34 = vrot.slane %v3312_v6, 4 }
 0xaab   :  { %v3314_v26 = vadd.f32 %v3313_v34, %v3312_v6 }
 0xaad   :  { %v3315_v29 = vrot.slane %v3314_v26, 2 }
 0xaaf   :  { %v3316_v43 = vadd.f32 %v3315_v29, %v3314_v26 }
 0xab1   :  { %v3317_v24 = vrot.slane %v3316_v43, 1 }
 0xab3   :  { %v3318_v42 = vadd.f32 %v3317_v24, %v3316_v43 }
 0xab5   :  { %v3319_v15 = vsub.f32 0.0, %v3318_v42 }
 0xab7   :  { %v3320_v30 = vmul.f32 1.442695, %v3319_v15 }
 0xab9   :  { %4332 = vpow2.f32 %v3320_v30 }
 0xac3   :  { %v4333_v31 = vpop.eup %4332 }
 0xac4   :  { %v3322_v32 = vadd.f32 1.0, %v4333_v31 }
 0xac6   :  { %4334 = vrcp.f32 %v3322_v32 }
 0xad0   :  { %v4335_v35 = vpop.eup %4334 }
 0xad1   :  { %3327 = vperm.xlu0 %4262, %v4335_v35  }
 0xb50   :  { %v3328_v22 = vpop.permute.xlu0 %3327 }
 0xb51   :  { %3331 = vst [vmem:[#allocation5 + $0x8] sm:$0xff] %v3328_v22 }
 0xb52   :  { %4394 = shalt.err (!%p4391_p12)
}
 0xb53   :  { %s4395_s13 = scalar_lea.hbm %s5088_s3, 256 }
 0xb54   :  { %p4396_p13 = scmp.ne.s32.totalorder %s5088_s3, %s4395_s13  ;;  %p4399_p0 = scmp.lt.u32.totalorder %s4395_s13, %s5088_s3 }
 0xb56   :  { %p4401_p1 = pnand %p4399_p0, %p4396_p13 }
 0xb58   :  { %4404 = shalt.err (!%p4401_p1)
}
 0xb59   :  { %3343 = dma.vmem_to_hbm [thread:$0]  %s3338_s9, 256, %s5088_s3, [#allocation4], %s4410_s22, %s4410_s22, %s4411_s23  }
 0xb5a   :  { %4407 = dma.done.wait [#allocation4], 256  }
 0xb5b   :  { %4408 = vsyncadd [#allocation4], 4294967040 }
 0xb5c   :  { %3347 = vsyncpa [#allocation3], 1 }
 0xb5d   :  { %3348 = vsyncpa [#allocation4], 1 }

</bundles_post_ra>
